<compile_context>
chip_gen: v5e
topology: v5e:2x2
jax: 0.10.0
libtpu: 0.0.40
codegen_flags: <defaults>
</compile_context>

<pallas_src>
import jax
import jax.numpy as jnp
from jax import lax
from jax.experimental import pallas as pl
from jax.experimental.pallas import tpu as pltpu

_LANE = 128


def _round_up(x, m):
    return (x + m - 1) // m * m


# ----------------------------- Pallas kernel ------------------------------ #

def _gemm_bn_relu_kernel(p_ref, w_ref, scale_ref, shift_ref, o_ref):
    """One M-tile of:  relu((patches @ W) * scale + shift).

    p_ref:     (TILE_M, K_pad)    bf16 im2col patch tile
    w_ref:     (K_pad, Cout_pad)  bf16 conv weights (constant block, resident)
    scale_ref: (1, Cout_pad)      f32 BN scale  = gamma / sqrt(var + eps)
    shift_ref: (1, Cout_pad)      f32 BN shift  = (conv_bias - mean)*scale + beta
    o_ref:     (TILE_M, Cout_pad) output tile (bf16 or f32)
    """
    acc = jnp.dot(p_ref[...], w_ref[...], preferred_element_type=jnp.float32)
    y = acc * scale_ref[...] + shift_ref[...]
    o_ref[...] = jnp.maximum(y, 0.0).astype(o_ref.dtype)


# ------------------------------ wrapper glue ------------------------------- #

def _im2col_3x3x3(x_ndhwc):
    """(N,D,H,W,C) -> (N*D*H*W, 27*C) for a 3x3x3 / pad=1 / stride=1 conv.

    Column order is tap-major, channel-minor: col = ((kd*3+kh)*3+kw)*C + c,
    matching the (kd,kh,kw,Cin,Cout) weight reshape below.
    """
    N, D, H, W, C = x_ndhwc.shape
    xp = jnp.pad(x_ndhwc, ((0, 0), (1, 1), (1, 1), (1, 1), (0, 0)))
    taps = [xp[:, kd:kd + D, kh:kh + H, kw:kw + W, :]
            for kd in range(3) for kh in range(3) for kw in range(3)]
    return jnp.concatenate(taps, axis=-1).reshape(N * D * H * W, 27 * C)


def conv3x3_bn_relu(x_ndhwc, w_oidhw, bias, gamma, beta, rmean, rvar,
                    *, eps=1e-5, out_dtype=jnp.float32, tile_m=512):
    """One Conv3d(k=3,s=1,p=1)+BatchNorm3d(eval)+ReLU block, NDHWC in/out."""
    N, D, H, W, Cin = x_ndhwc.shape
    Cout = w_oidhw.shape[0]
    M = N * D * H * W
    K = 27 * Cin
    k_pad = _round_up(K, _LANE)
    c_pad = _round_up(Cout, _LANE)
    tile_m = min(tile_m, _round_up(M, 16))
    m_pad = _round_up(M, tile_m)

    # im2col in bf16 (halves HBM traffic of the 27x-inflated patch buffer).
    patches = _im2col_3x3x3(x_ndhwc.astype(jnp.bfloat16))
    patches = jnp.pad(patches, ((0, m_pad - M), (0, k_pad - K)))

    # (Cout, Cin, 3,3,3) -> (3,3,3,Cin,Cout) -> (27*Cin, Cout), padded, bf16.
    w2d = jnp.transpose(w_oidhw, (2, 3, 4, 1, 0)).reshape(K, Cout)
    w2d = jnp.pad(w2d, ((0, k_pad - K), (0, c_pad - Cout))).astype(jnp.bfloat16)

    # Fold BN (eval running stats) + conv bias into a per-channel f32 affine.
    scale = (gamma / jnp.sqrt(rvar + eps)).astype(jnp.float32)
    shift = ((bias - rmean) * scale + beta).astype(jnp.float32)
    scale = jnp.pad(scale, (0, c_pad - Cout)).reshape(1, c_pad)
    shift = jnp.pad(shift, (0, c_pad - Cout)).reshape(1, c_pad)

    out = pl.pallas_call(
        _gemm_bn_relu_kernel,
        out_shape=jax.ShapeDtypeStruct((m_pad, c_pad), out_dtype),
        grid=(m_pad // tile_m,),
        in_specs=[
            pl.BlockSpec((tile_m, k_pad), lambda i: (i, 0)),
            pl.BlockSpec((k_pad, c_pad), lambda i: (0, 0)),
            pl.BlockSpec((1, c_pad), lambda i: (0, 0)),
            pl.BlockSpec((1, c_pad), lambda i: (0, 0)),
        ],
        out_specs=pl.BlockSpec((tile_m, c_pad), lambda i: (i, 0)),
        compiler_params=pltpu.CompilerParams(
            dimension_semantics=("parallel",),
            vmem_limit_bytes=48 * 1024 * 1024),
    )(patches, w2d, scale, shift)

    return out[:M, :Cout].reshape(N, D, H, W, Cout)


def init_double_conv(key, in_ch, out_ch):
    """Deterministic parameter init matching DoubleConv's shapes (eval mode)."""
    params = []
    cin = in_ch
    for i in range(2):
        ks = jax.random.split(jax.random.fold_in(key, i), 6)
        params.append(dict(
            w=jax.random.normal(ks[0], (out_ch, cin, 3, 3, 3), jnp.float32) * 0.1,
            b=jax.random.normal(ks[1], (out_ch,), jnp.float32) * 0.1,
            gamma=1.0 + 0.1 * jax.random.normal(ks[2], (out_ch,), jnp.float32),
            beta=0.1 * jax.random.normal(ks[3], (out_ch,), jnp.float32),
            rmean=0.1 * jax.random.normal(ks[4], (out_ch,), jnp.float32),
            rvar=1.0 + 0.5 * jax.random.uniform(ks[5], (out_ch,), jnp.float32),
        ))
        cin = out_ch
    return params


@jax.jit
def double_conv_fwd(x_ncdhw, params):
    """DoubleConv forward. Input/output are PyTorch-style NCDHW."""
    x = jnp.transpose(x_ncdhw, (0, 2, 3, 4, 1))                   # -> NDHWC
    n_blocks = len(params)
    for i, p in enumerate(params):
        inter = jnp.bfloat16 if i < n_blocks - 1 else jnp.float32
        x = conv3x3_bn_relu(x, p["w"], p["b"], p["gamma"], p["beta"],
                            p["rmean"], p["rvar"], out_dtype=inter)
    return jnp.transpose(x, (0, 4, 1, 2, 3))                      # -> NCDHW


# ------------------------------ references --------------------------------- #

def _matched_block_ref(x_ndhwc, p, out_dtype, eps=1e-5):
    """Pure-JAX reference with the kernel's exact bf16/f32 mixed precision."""
    N, D, H, W, Cin = x_ndhwc.shape
    Cout = p["w"].shape[0]
    patches = _im2col_3x3x3(x_ndhwc.astype(jnp.bfloat16))
    w2d = jnp.transpose(p["w"], (2, 3, 4, 1, 0)).reshape(27 * Cin, Cout)
    acc = jnp.dot(patches, w2d.astype(jnp.bfloat16),
                  preferred_element_type=jnp.float32)
    scale = p["gamma"] / jnp.sqrt(p["rvar"] + eps)
    shift = (p["b"] - p["rmean"]) * scale + p["beta"]
    y = jnp.maximum(acc * scale + shift, 0.0)
    return y.reshape(N, D, H, W, Cout).astype(out_dtype)


def _matched_fwd(x_ncdhw, params):
    x = jnp.transpose(x_ncdhw, (0, 2, 3, 4, 1))
    n = len(params)
    for i, p in enumerate(params):
        inter = jnp.bfloat16 if i < n - 1 else jnp.float32
        x = _matched_block_ref(x, p, inter)
    return jnp.transpose(x, (0, 4, 1, 2, 3))


def _f32_block_ref(x_ndhwc, p, eps=1e-5):
    """Full-f32 reference of the PyTorch eval-mode semantics."""
    w_dhwio = jnp.transpose(p["w"], (2, 3, 4, 1, 0))
    y = lax.conv_general_dilated(
        x_ndhwc, w_dhwio, window_strides=(1, 1, 1),
        padding=((1, 1), (1, 1), (1, 1)),
        dimension_numbers=("NDHWC", "DHWIO", "NDHWC")) + p["b"]
    y = (y - p["rmean"]) / jnp.sqrt(p["rvar"] + eps) * p["gamma"] + p["beta"]
    return jnp.maximum(y, 0.0)


def _f32_fwd(x_ncdhw, params):
    x = jnp.transpose(x_ncdhw, (0, 2, 3, 4, 1))
    for p in params:
        x = _f32_block_ref(x, p)
    return jnp.transpose(x, (0, 4, 1, 2, 3))


# ---------------------------------- main ------------------------------------ #

if __name__ == "__main__":
    key = jax.random.PRNGKey(0)
    k_x, k_p = jax.random.split(key)

    # DoubleConv(in_ch=4, out_ch=8), input NCDHW.
    N, Cin, D, H, W = 2, 4, 8, 8, 8
    Cout = 8

    x = jax.random.normal(k_x, (N, Cin, D, H, W), jnp.float32)
    params = init_double_conv(k_p, Cin, Cout)

    out = jax.block_until_ready(double_conv_fwd(x, params))
    assert out.shape == (N, Cout, D, H, W), out.shape

    # Tight check vs a pure-JAX reference using the kernel's exact precision
    # (bf16 operands, f32 accumulation, bf16 inter-block activation).
    ref_matched = jax.block_until_ready(_matched_fwd(x, params))
    err_matched = float(jnp.max(jnp.abs(out - ref_matched)))
    assert err_matched < 5e-3, f"matched-precision max abs error {err_matched}"

    # Loose sanity check vs full-f32 PyTorch-eval semantics (bf16 operands
    # introduce ~1e-2 quantization error, which is expected).
    ref_f32 = jax.block_until_ready(_f32_fwd(x, params))
    err_f32 = float(jnp.max(jnp.abs(out - ref_f32)))
    assert err_f32 < 1e-1, f"f32-reference max abs error {err_f32}"

    print("KERNEL_OK")
</pallas_src>

<mosaic_0001>
module attributes {stable_mosaic.version = 11 : i64} {
  func.func @_gemm_bn_relu_kernel(%arg0: i32, %arg1: memref<512x128xbf16, #tpu.memory_space<vmem>>, %arg2: memref<128x128xbf16, #tpu.memory_space<vmem>>, %arg3: memref<1x128xf32, #tpu.memory_space<vmem>>, %arg4: memref<1x128xf32, #tpu.memory_space<vmem>>, %arg5: memref<512x128xbf16, #tpu.memory_space<vmem>>) attributes {dimension_semantics = [#tpu.dimension_semantics<parallel>], iteration_bounds = array<i64: 2>, scalar_prefetch = 0 : i64, scratch_operands = 0 : i64, tpu.core_type = #tpu.core_type<tc>, window_params = [{transform_indices = @transform_0, window_bounds = array<i64: 512, 128>}, {pipeline_mode = #tpu.pipeline_mode<synchronous>, transform_indices = @transform_1, window_bounds = array<i64: 128, 128>}, {pipeline_mode = #tpu.pipeline_mode<synchronous>, transform_indices = @transform_2, window_bounds = array<i64: 1, 128>}, {pipeline_mode = #tpu.pipeline_mode<synchronous>, transform_indices = @transform_3, window_bounds = array<i64: 1, 128>}, {transform_indices = @transform_4, window_bounds = array<i64: 512, 128>}]} {
    %c0 = arith.constant 0 : index
    %c0_0 = arith.constant 0 : index
    %0 = vector.load %arg1[%c0, %c0_0] : memref<512x128xbf16, #tpu.memory_space<vmem>>, vector<512x128xbf16>
    %c0_1 = arith.constant 0 : index
    %c0_2 = arith.constant 0 : index
    %1 = vector.load %arg2[%c0_1, %c0_2] : memref<128x128xbf16, #tpu.memory_space<vmem>>, vector<128x128xbf16>
    %cst = arith.constant dense<0.000000e+00> : vector<512x128xf32>
    %2 = tpu.matmul %0, %1, %cst {dimension_numbers = #tpu.dot_dimension_numbers<[1], [0], [0], [1], [0, 0, 1, 1], [], []>} : vector<512x128xbf16>, vector<128x128xbf16>, vector<512x128xf32> -> vector<512x128xf32>
    %c0_3 = arith.constant 0 : index
    %c0_4 = arith.constant 0 : index
    %3 = vector.load %arg3[%c0_3, %c0_4] : memref<1x128xf32, #tpu.memory_space<vmem>>, vector<1x128xf32>
    %4 = vector.broadcast %3 : vector<1x128xf32> to vector<512x128xf32>
    %5 = arith.mulf %2, %4 : vector<512x128xf32>
    %c0_5 = arith.constant 0 : index
    %c0_6 = arith.constant 0 : index
    %6 = vector.load %arg4[%c0_5, %c0_6] : memref<1x128xf32, #tpu.memory_space<vmem>>, vector<1x128xf32>
    %7 = vector.broadcast %6 : vector<1x128xf32> to vector<512x128xf32>
    %8 = arith.addf %5, %7 : vector<512x128xf32>
    %cst_7 = arith.constant 0.000000e+00 : f32
    %9 = vector.broadcast %cst_7 : f32 to vector<512x128xf32>
    %10 = arith.maximumf %8, %9 : vector<512x128xf32>
    %11 = arith.truncf %10 : vector<512x128xf32> to vector<512x128xbf16>
    %c0_8 = arith.constant 0 : index
    %c0_9 = arith.constant 0 : index
    %12 = vector.load %arg5[%c0_8, %c0_9] : memref<512x128xbf16, #tpu.memory_space<vmem>>, vector<512x128xbf16>
    tpu.vector_store %arg5[%c0_8, %c0_9], %11 {strides = array<i32>} : memref<512x128xbf16, #tpu.memory_space<vmem>>, vector<512x128xbf16>,
    return
  }
  func.func @transform_0(%arg0: i32) -> (i32, i32) {
    %c0_i32 = arith.constant 0 : i32
    %c0_i32_0 = arith.constant 0 : i32
    return %arg0, %c0_i32 : i32, i32
  }
  func.func @transform_1(%arg0: i32) -> (i32, i32) {
    %c0_i32 = arith.constant 0 : i32
    %c0_i32_0 = arith.constant 0 : i32
    %c0_i32_1 = arith.constant 0 : i32
    return %c0_i32, %c0_i32_0 : i32, i32
  }
  func.func @transform_2(%arg0: i32) -> (i32, i32) {
    %c0_i32 = arith.constant 0 : i32
    %c0_i32_0 = arith.constant 0 : i32
    %c0_i32_1 = arith.constant 0 : i32
    return %c0_i32, %c0_i32_0 : i32, i32
  }
  func.func @transform_3(%arg0: i32) -> (i32, i32) {
    %c0_i32 = arith.constant 0 : i32
    %c0_i32_0 = arith.constant 0 : i32
    %c0_i32_1 = arith.constant 0 : i32
    return %c0_i32, %c0_i32_0 : i32, i32
  }
  func.func @transform_4(%arg0: i32) -> (i32, i32) {
    %c0_i32 = arith.constant 0 : i32
    %c0_i32_0 = arith.constant 0 : i32
    return %arg0, %c0_i32 : i32, i32
  }
}

module attributes {stable_mosaic.version = 11 : i64} {
  func.func @_gemm_bn_relu_kernel(%arg0: i32, %arg1: memref<512x256xbf16, #tpu.memory_space<vmem>>, %arg2: memref<256x128xbf16, #tpu.memory_space<vmem>>, %arg3: memref<1x128xf32, #tpu.memory_space<vmem>>, %arg4: memref<1x128xf32, #tpu.memory_space<vmem>>, %arg5: memref<512x128xf32, #tpu.memory_space<vmem>>) attributes {dimension_semantics = [#tpu.dimension_semantics<parallel>], iteration_bounds = array<i64: 2>, scalar_prefetch = 0 : i64, scratch_operands = 0 : i64, tpu.core_type = #tpu.core_type<tc>, window_params = [{transform_indices = @transform_0, window_bounds = array<i64: 512, 256>}, {pipeline_mode = #tpu.pipeline_mode<synchronous>, transform_indices = @transform_1, window_bounds = array<i64: 256, 128>}, {pipeline_mode = #tpu.pipeline_mode<synchronous>, transform_indices = @transform_2, window_bounds = array<i64: 1, 128>}, {pipeline_mode = #tpu.pipeline_mode<synchronous>, transform_indices = @transform_3, window_bounds = array<i64: 1, 128>}, {transform_indices = @transform_4, window_bounds = array<i64: 512, 128>}]} {
    %c0 = arith.constant 0 : index
    %c0_0 = arith.constant 0 : index
    %0 = vector.load %arg1[%c0, %c0_0] : memref<512x256xbf16, #tpu.memory_space<vmem>>, vector<512x256xbf16>
    %c0_1 = arith.constant 0 : index
    %c0_2 = arith.constant 0 : index
    %1 = vector.load %arg2[%c0_1, %c0_2] : memref<256x128xbf16, #tpu.memory_space<vmem>>, vector<256x128xbf16>
    %cst = arith.constant dense<0.000000e+00> : vector<512x128xf32>
    %2 = tpu.matmul %0, %1, %cst {dimension_numbers = #tpu.dot_dimension_numbers<[1], [0], [0], [1], [0, 0, 1, 1], [], []>} : vector<512x256xbf16>, vector<256x128xbf16>, vector<512x128xf32> -> vector<512x128xf32>
    %c0_3 = arith.constant 0 : index
    %c0_4 = arith.constant 0 : index
    %3 = vector.load %arg3[%c0_3, %c0_4] : memref<1x128xf32, #tpu.memory_space<vmem>>, vector<1x128xf32>
    %4 = vector.broadcast %3 : vector<1x128xf32> to vector<512x128xf32>
    %5 = arith.mulf %2, %4 : vector<512x128xf32>
    %c0_5 = arith.constant 0 : index
    %c0_6 = arith.constant 0 : index
    %6 = vector.load %arg4[%c0_5, %c0_6] : memref<1x128xf32, #tpu.memory_space<vmem>>, vector<1x128xf32>
    %7 = vector.broadcast %6 : vector<1x128xf32> to vector<512x128xf32>
    %8 = arith.addf %5, %7 : vector<512x128xf32>
    %cst_7 = arith.constant 0.000000e+00 : f32
    %9 = vector.broadcast %cst_7 : f32 to vector<512x128xf32>
    %10 = arith.maximumf %8, %9 : vector<512x128xf32>
    %c0_8 = arith.constant 0 : index
    %c0_9 = arith.constant 0 : index
    %11 = vector.load %arg5[%c0_8, %c0_9] : memref<512x128xf32, #tpu.memory_space<vmem>>, vector<512x128xf32>
    tpu.vector_store %arg5[%c0_8, %c0_9], %10 {strides = array<i32>} : memref<512x128xf32, #tpu.memory_space<vmem>>, vector<512x128xf32>,
    return
  }
  func.func @transform_0(%arg0: i32) -> (i32, i32) {
    %c0_i32 = arith.constant 0 : i32
    %c0_i32_0 = arith.constant 0 : i32
    return %arg0, %c0_i32 : i32, i32
  }
  func.func @transform_1(%arg0: i32) -> (i32, i32) {
    %c0_i32 = arith.constant 0 : i32
    %c0_i32_0 = arith.constant 0 : i32
    %c0_i32_1 = arith.constant 0 : i32
    return %c0_i32, %c0_i32_0 : i32, i32
  }
  func.func @transform_2(%arg0: i32) -> (i32, i32) {
    %c0_i32 = arith.constant 0 : i32
    %c0_i32_0 = arith.constant 0 : i32
    %c0_i32_1 = arith.constant 0 : i32
    return %c0_i32, %c0_i32_0 : i32, i32
  }
  func.func @transform_3(%arg0: i32) -> (i32, i32) {
    %c0_i32 = arith.constant 0 : i32
    %c0_i32_0 = arith.constant 0 : i32
    %c0_i32_1 = arith.constant 0 : i32
    return %c0_i32, %c0_i32_0 : i32, i32
  }
  func.func @transform_4(%arg0: i32) -> (i32, i32) {
    %c0_i32 = arith.constant 0 : i32
    %c0_i32_0 = arith.constant 0 : i32
    return %arg0, %c0_i32 : i32, i32
  }
}

</mosaic_0001>

<bundles_post_ra>
// kernel: double_conv_fwd.2
= control target key start
LH: loop header
LB: loop body
LE: loop exit
PB: predicated region body
PF: predicated region fallthrough
CT: control target
= control target key end

     0   :  { %s1543_s15 = smov 0   ;;  %s1797_s0 = inlined_call_operand.vmem [shape: bf16[1024,128], index: 0, kind: input, shape index: {}]   ;;  %s1798_s1 = inlined_call_operand.vmem [shape: bf16[128,128], index: 1, kind: input, shape index: {}]   ;;  %s1799_s2 = inlined_call_operand.vmem [shape: f32[1,128], index: 2, kind: input, shape index: {}]   ;;  %s1800_s3 = inlined_call_operand.vmem [shape: f32[1,128], index: 3, kind: input, shape index: {}]   ;;  %s1801_s4 = inlined_call_operand.vmem [shape: bf16[1024,128], index: 4, kind: output, shape index: {}]  }
   0x1 LB: > { %s1074_s16 = sadd.s32 4294967295, %s1516_s15   ;;  %p1078_p0 = scmp.ge.s32.totalorder %s1516_s15, 1  ;;  %s1516_s15 = sphi %s1543_s15, %s14_s15  }
   0x2   : > { %p163_p1 = scmp.lt.s32.totalorder %s1516_s15, 3 }
   0x4   : > { %p164_p2 = pnand %p1078_p0, %p163_p1 }
   0x5   : > { %s1079_s25 = sshll.u32 (!%p164_p2), %s1074_s16, 6 }
   0x6   : > { %167 = sbr.rel (%p164_p2) target bundleno = 306 (0x132), region = 36  ;;  %p190_p3 = scmp.lt.s32.totalorder (!%p164_p2), %s1079_s25, 127 }
   0xb   : > { %v1284_v0 = vld [vmem:[%s1798_s1 + $0x38] sm:$0xff]  ;;  %v1283_v1 = vld [vmem:[%s1798_s1 + $0x30] sm:$0xff]  ;;  %v1282_v2 = vld [vmem:[%s1798_s1 + $0x28] sm:$0xff]  ;;  %s1803_s25 = smov (!%p190_p3, %s1079_s25), 127 }
   0xc   : > { %521 = vmatpush.bf16.msra.mxu0 %v1284_v0  ;;  %1476 = vmatpush.bf16.msra.mxu1 %v1284_v0  ;;  %v1281_v3 = vld [vmem:[%s1798_s1 + $0x20] sm:$0xff]  ;;  %v1280_v4 = vld [vmem:[%s1798_s1 + $0x18] sm:$0xff]  ;;  %v1279_v5 = vld [vmem:[%s1798_s1 + $0x10] sm:$0xff]  ;;  %s1080_s6 = sshll.u32 %s1803_s25, 2 }
   0xd   : > { %1477 = vmatpush.bf16.msra.mxu2 %v1284_v0  ;;  %1478 = vmatpush.bf16.msra.mxu3 %v1284_v0  ;;  %v1278_v6 = vld [vmem:[%s1798_s1 + $0x8] sm:$0xff]  ;;  %v1277_v7 = vld [vmem:[%s1798_s1] sm:$0xff]  ;;  %s1583_s11 = scalar_lea.vmem %s1797_s0, %s1080_s6  ;;  %s1642_s19 = scalar_lea.vmem %s1801_s4, %s1080_s6 }
   0xe   : > { %v1245_v8 = vld [vmem:[%s1583_s11] sm:$0xff]  ;;  %v1246_v12 = vld [vmem:[%s1583_s11 + $0x8] sm:$0xff]  ;;  %v1247_v16 = vld [vmem:[%s1583_s11 + $0x10] sm:$0xff] }
   0xf   : > { %v1253_v9 = vld [vmem:[%s1583_s11 + $0x40] sm:$0xff]  ;;  %v1254_v13 = vld [vmem:[%s1583_s11 + $0x48] sm:$0xff]  ;;  %v1255_v17 = vld [vmem:[%s1583_s11 + $0x50] sm:$0xff] }
  0x10   : > { %522 = vmatpush.bf16.msra.mxu0 %v1283_v1  ;;  %1479 = vmatpush.bf16.msra.mxu1 %v1283_v1  ;;  %v1261_v10 = vld [vmem:[%s1583_s11 + $0x80] sm:$0xff]  ;;  %v1262_v14 = vld [vmem:[%s1583_s11 + $0x88] sm:$0xff]  ;;  %v1263_v18 = vld [vmem:[%s1583_s11 + $0x90] sm:$0xff] }
  0x11   : > { %1480 = vmatpush.bf16.msra.mxu2 %v1283_v1  ;;  %1481 = vmatpush.bf16.msra.mxu3 %v1283_v1  ;;  %v1269_v11 = vld [vmem:[%s1583_s11 + $0xc0] sm:$0xff]  ;;  %v1270_v15 = vld [vmem:[%s1583_s11 + $0xc8] sm:$0xff]  ;;  %v1271_v19 = vld [vmem:[%s1583_s11 + $0xd0] sm:$0xff] }
  0x12   : > { %v1248_v20 = vld [vmem:[%s1583_s11 + $0x18] sm:$0xff]  ;;  %v1249_v24 = vld [vmem:[%s1583_s11 + $0x20] sm:$0xff]  ;;  %v1250_v28 = vld [vmem:[%s1583_s11 + $0x28] sm:$0xff] }
  0x13   : > { %v1256_v21 = vld [vmem:[%s1583_s11 + $0x58] sm:$0xff]  ;;  %v1257_v25 = vld [vmem:[%s1583_s11 + $0x60] sm:$0xff]  ;;  %v1258_v29 = vld [vmem:[%s1583_s11 + $0x68] sm:$0xff] }
  0x14   : > { %523 = vmatpush.bf16.msra.mxu0 %v1282_v2  ;;  %1482 = vmatpush.bf16.msra.mxu1 %v1282_v2  ;;  %v1264_v22 = vld [vmem:[%s1583_s11 + $0x98] sm:$0xff]  ;;  %v1265_v26 = vld [vmem:[%s1583_s11 + $0xa0] sm:$0xff]  ;;  %v1266_v30 = vld [vmem:[%s1583_s11 + $0xa8] sm:$0xff] }
  0x15   : > { %1483 = vmatpush.bf16.msra.mxu2 %v1282_v2  ;;  %1484 = vmatpush.bf16.msra.mxu3 %v1282_v2  ;;  %v1272_v23 = vld [vmem:[%s1583_s11 + $0xd8] sm:$0xff]  ;;  %v1273_v27 = vld [vmem:[%s1583_s11 + $0xe0] sm:$0xff]  ;;  %v1274_v31 = vld [vmem:[%s1583_s11 + $0xe8] sm:$0xff] }
  0x16   : > { %v1251_v32 = vld [vmem:[%s1583_s11 + $0x30] sm:$0xff]  ;;  %v1252_v36 = vld [vmem:[%s1583_s11 + $0x38] sm:$0xff]  ;;  %v1620_v42 = vld [vmem:[%s1799_s2] ss:$0 sm:$0xff] }
  0x17   : > { %v1259_v33 = vld [vmem:[%s1583_s11 + $0x70] sm:$0xff]  ;;  %v1260_v37 = vld [vmem:[%s1583_s11 + $0x78] sm:$0xff]  ;;  %v1626_v44 = vld [vmem:[%s1800_s3] ss:$0 sm:$0xff] }
  0x18   : > { %524 = vmatpush.bf16.msra.mxu0 %v1281_v3  ;;  %1485 = vmatpush.bf16.msra.mxu1 %v1281_v3  ;;  %v1267_v34 = vld [vmem:[%s1583_s11 + $0xb0] sm:$0xff]  ;;  %v1268_v38 = vld [vmem:[%s1583_s11 + $0xb8] sm:$0xff] }
  0x19   : > { %1486 = vmatpush.bf16.msra.mxu2 %v1281_v3  ;;  %1487 = vmatpush.bf16.msra.mxu3 %v1281_v3  ;;  %v1275_v35 = vld [vmem:[%s1583_s11 + $0xf0] sm:$0xff]  ;;  %v1276_v39 = vld [vmem:[%s1583_s11 + $0xf8] sm:$0xff] }
  0x1c   : > { %525 = vmatpush.bf16.msra.mxu0 %v1280_v4  ;;  %1488 = vmatpush.bf16.msra.mxu1 %v1280_v4 }
  0x1d   : > { %1489 = vmatpush.bf16.msra.mxu2 %v1280_v4  ;;  %1490 = vmatpush.bf16.msra.mxu3 %v1280_v4 }
  0x20   : > { %526 = vmatpush.bf16.msra.mxu0 %v1279_v5  ;;  %1491 = vmatpush.bf16.msra.mxu1 %v1279_v5 }
  0x21   : > { %1492 = vmatpush.bf16.msra.mxu2 %v1279_v5  ;;  %1493 = vmatpush.bf16.msra.mxu3 %v1279_v5 }
  0x24   : > { %527 = vmatpush.bf16.msra.mxu0 %v1278_v6  ;;  %1494 = vmatpush.bf16.msra.mxu1 %v1278_v6 }
  0x25   : > { %1495 = vmatpush.bf16.msra.mxu2 %v1278_v6  ;;  %1496 = vmatpush.bf16.msra.mxu3 %v1278_v6 }
  0x28   : > { %528 = vmatpush.bf16.msra.mxu0 %v1277_v7  ;;  %1497 = vmatpush.bf16.msra.mxu1 %v1277_v7 }
  0x29   : > { %1498 = vmatpush.bf16.msra.mxu2 %v1277_v7  ;;  %1499 = vmatpush.bf16.msra.mxu3 %v1277_v7 }
  0x2b   : > { %529 = vmatmul.bf16.vlgmr.msra.gmra.mxu0 %v1245_v8  ;;  %569 = vmatmul.bf16.vlgmr.msra.gmra.mxu1 %v1253_v9 }
  0x2c   : > { %609 = vmatmul.bf16.vlgmr.msra.gmra.mxu2 %v1261_v10  ;;  %649 = vmatmul.bf16.vlgmr.msra.gmra.mxu3 %v1269_v11 }
  0x3b   : > { %534 = vmatmul.bf16.gmra.mxu0 %v1246_v12  ;;  %574 = vmatmul.bf16.gmra.mxu1 %v1254_v13 }
  0x3c   : > { %614 = vmatmul.bf16.gmra.mxu2 %v1262_v14  ;;  %654 = vmatmul.bf16.gmra.mxu3 %v1270_v15 }
  0x4b   : > { %539 = vmatmul.bf16.gmra.mxu0 %v1247_v16  ;;  %579 = vmatmul.bf16.gmra.mxu1 %v1255_v17 }
  0x4c   : > { %619 = vmatmul.bf16.gmra.mxu2 %v1263_v18  ;;  %659 = vmatmul.bf16.gmra.mxu3 %v1271_v19 }
  0x5b   : > { %544 = vmatmul.bf16.gmra.mxu0 %v1248_v20  ;;  %584 = vmatmul.bf16.gmra.mxu1 %v1256_v21 }
  0x5c   : > { %624 = vmatmul.bf16.gmra.mxu2 %v1264_v22  ;;  %664 = vmatmul.bf16.gmra.mxu3 %v1272_v23 }
  0x6b   : > { %549 = vmatmul.bf16.gmra.mxu0 %v1249_v24  ;;  %589 = vmatmul.bf16.gmra.mxu1 %v1257_v25 }
  0x6c   : > { %629 = vmatmul.bf16.gmra.mxu2 %v1265_v26  ;;  %669 = vmatmul.bf16.gmra.mxu3 %v1273_v27 }
  0x7b   : > { %554 = vmatmul.bf16.gmra.mxu0 %v1250_v28  ;;  %594 = vmatmul.bf16.gmra.mxu1 %v1258_v29 }
  0x7c   : > { %634 = vmatmul.bf16.gmra.mxu2 %v1266_v30  ;;  %674 = vmatmul.bf16.gmra.mxu3 %v1274_v31 }
  0x8b   : > { %559 = vmatmul.bf16.gmra.mxu0 %v1251_v32  ;;  %599 = vmatmul.bf16.gmra.mxu1 %v1259_v33 }
  0x8c   : > { %639 = vmatmul.bf16.gmra.mxu2 %v1267_v34  ;;  %679 = vmatmul.bf16.gmra.mxu3 %v1275_v35 }
  0x9b   : > { %564 = vmatmul.bf16.gmra.mxu0 %v1252_v36  ;;  %604 = vmatmul.bf16.gmra.mxu1 %v1260_v37 }
  0x9c   : > { %644 = vmatmul.bf16.gmra.mxu2 %v1268_v38  ;;  %684 = vmatmul.bf16.gmra.mxu3 %v1276_v39 }
  0xa8   : > { %v530_v40 = vpop.f32.mrf.mxu0  ;;  %v570_v41 = vpop.f32.mrf.mxu1 }
  0xa9   : > { %v694_v43 = vmul.f32 %v1620_v42, %v530_v40  ;;  %v710_v45 = vmul.f32 %v1620_v42, %v570_v41 }
  0xab   : > { %v762_v50 = vadd.f32 %v1626_v44, %v694_v43  ;;  %v778_v51 = vadd.f32 %v1626_v44, %v710_v45 }
  0xad   : > { %v826_v58 = vmax.f32 %v762_v50, 0.0  ;;  %v842_v59 = vmax.f32 %v778_v51, 0.0 }
  0xaf   : > { %v610_v46 = vpop.f32.mrf.mxu2  ;;  %v650_v47 = vpop.f32.mrf.mxu3 }
  0xb0   : > { %v532_v48 = vpop.f32.mrf.mxu0  ;;  %v572_v49 = vpop.f32.mrf.mxu1  ;;  %v726_v56 = vmul.f32 %v1620_v42, %v610_v46  ;;  %v742_v57 = vmul.f32 %v1620_v42, %v650_v47 }
  0xb1   : > { %v695_v52 = vmul.f32 %v1620_v42, %v532_v48  ;;  %v711_v53 = vmul.f32 %v1620_v42, %v572_v49 }
  0xb2   : > { %v794_v2 = vadd.f32 %v1626_v44, %v726_v56  ;;  %v810_v3 = vadd.f32 %v1626_v44, %v742_v57 }
  0xb3   : > { %v763_v54 = vadd.f32 %v1626_v44, %v695_v52  ;;  %v779_v55 = vadd.f32 %v1626_v44, %v711_v53 }
  0xb4   : > { %v858_v10 = vmax.f32 %v794_v2, 0.0  ;;  %v874_v11 = vmax.f32 %v810_v3, 0.0 }
  0xb5   : > { %v827_v60 = vmax.f32 %v763_v54, 0.0  ;;  %v843_v61 = vmax.f32 %v779_v55, 0.0 }
  0xb7   : > { %v1288_v62 = vpack.c.bf16 %v827_v60, %v826_v58  ;;  %v1328_v63 = vpack.c.bf16 %v843_v61, %v842_v59  ;;  %v612_v0 = vpop.f32.mrf.mxu2  ;;  %v652_v1 = vpop.f32.mrf.mxu3 }
  0xb8   : > { %v727_v4 = vmul.f32 %v1620_v42, %v612_v0  ;;  %v743_v5 = vmul.f32 %v1620_v42, %v652_v1  ;;  %v535_v6 = vpop.f32.mrf.mxu0  ;;  %v575_v7 = vpop.f32.mrf.mxu1 }
  0xb9   : > { %1289 = vst [vmem:[%s1642_s19] sm:$0xff] %v1288_v62   ;;  %v696_v14 = vmul.f32 %v1620_v42, %v535_v6  ;;  %v712_v15 = vmul.f32 %v1620_v42, %v575_v7 }
  0xba   : > { %1452 = vst [vmem:[%s1642_s19 + $0x40] sm:$0xff] %v1328_v63   ;;  %v795_v8 = vadd.f32 %v1626_v44, %v727_v4  ;;  %v811_v9 = vadd.f32 %v1626_v44, %v743_v5 }
  0xbb   : > { %v764_v22 = vadd.f32 %v1626_v44, %v696_v14  ;;  %v780_v23 = vadd.f32 %v1626_v44, %v712_v15 }
  0xbc   : > { %v859_v12 = vmax.f32 %v795_v8, 0.0  ;;  %v875_v13 = vmax.f32 %v811_v9, 0.0 }
  0xbd   : > { %v828_v30 = vmax.f32 %v764_v22, 0.0  ;;  %v844_v31 = vmax.f32 %v780_v23, 0.0 }
  0xbe   : > { %v1368_v16 = vpack.c.bf16 %v859_v12, %v858_v10  ;;  %v1408_v17 = vpack.c.bf16 %v875_v13, %v874_v11 }
  0xbf   : > { %v615_v18 = vpop.f32.mrf.mxu2  ;;  %v655_v19 = vpop.f32.mrf.mxu3 }
  0xc0   : > { %1460 = vst [vmem:[%s1642_s19 + $0x80] sm:$0xff] %v1368_v16   ;;  %v537_v20 = vpop.f32.mrf.mxu0  ;;  %v577_v21 = vpop.f32.mrf.mxu1  ;;  %v728_v28 = vmul.f32 %v1620_v42, %v615_v18  ;;  %v744_v29 = vmul.f32 %v1620_v42, %v655_v19 }
  0xc1   : > { %1468 = vst [vmem:[%s1642_s19 + $0xc0] sm:$0xff] %v1408_v17   ;;  %v697_v24 = vmul.f32 %v1620_v42, %v537_v20  ;;  %v713_v25 = vmul.f32 %v1620_v42, %v577_v21 }
  0xc2   : > { %v796_v38 = vadd.f32 %v1626_v44, %v728_v28  ;;  %v812_v39 = vadd.f32 %v1626_v44, %v744_v29 }
  0xc3   : > { %v765_v26 = vadd.f32 %v1626_v44, %v697_v24  ;;  %v781_v27 = vadd.f32 %v1626_v44, %v713_v25 }
  0xc4   : > { %v860_v48 = vmax.f32 %v796_v38, 0.0  ;;  %v876_v49 = vmax.f32 %v812_v39, 0.0 }
  0xc5   : > { %v829_v32 = vmax.f32 %v765_v26, 0.0  ;;  %v845_v33 = vmax.f32 %v781_v27, 0.0 }
  0xc7   : > { %v1293_v34 = vpack.c.bf16 %v829_v32, %v828_v30  ;;  %v1333_v35 = vpack.c.bf16 %v845_v33, %v844_v31  ;;  %v617_v36 = vpop.f32.mrf.mxu2  ;;  %v657_v37 = vpop.f32.mrf.mxu3 }
  0xc8   : > { %v729_v40 = vmul.f32 %v1620_v42, %v617_v36  ;;  %v745_v41 = vmul.f32 %v1620_v42, %v657_v37  ;;  %v540_v43 = vpop.f32.mrf.mxu0  ;;  %v580_v45 = vpop.f32.mrf.mxu1 }
  0xc9   : > { %1445 = vst [vmem:[%s1642_s19 + $0x8] sm:$0xff] %v1293_v34   ;;  %v698_v52 = vmul.f32 %v1620_v42, %v540_v43  ;;  %v714_v53 = vmul.f32 %v1620_v42, %v580_v45 }
  0xca   : > { %1453 = vst [vmem:[%s1642_s19 + $0x48] sm:$0xff] %v1333_v35   ;;  %v797_v46 = vadd.f32 %v1626_v44, %v729_v40  ;;  %v813_v47 = vadd.f32 %v1626_v44, %v745_v41 }
  0xcb   : > { %v766_v60 = vadd.f32 %v1626_v44, %v698_v52  ;;  %v782_v61 = vadd.f32 %v1626_v44, %v714_v53 }
  0xcc   : > { %v861_v50 = vmax.f32 %v797_v46, 0.0  ;;  %v877_v51 = vmax.f32 %v813_v47, 0.0 }
  0xcd   : > { %v830_v4 = vmax.f32 %v766_v60, 0.0  ;;  %v846_v5 = vmax.f32 %v782_v61, 0.0 }
  0xce   : > { %v1373_v54 = vpack.c.bf16 %v861_v50, %v860_v48  ;;  %v1413_v55 = vpack.c.bf16 %v877_v51, %v876_v49 }
  0xcf   : > { %v620_v56 = vpop.f32.mrf.mxu2  ;;  %v660_v57 = vpop.f32.mrf.mxu3 }
  0xd0   : > { %1461 = vst [vmem:[%s1642_s19 + $0x88] sm:$0xff] %v1373_v54   ;;  %v542_v58 = vpop.f32.mrf.mxu0  ;;  %v582_v59 = vpop.f32.mrf.mxu1  ;;  %v730_v2 = vmul.f32 %v1620_v42, %v620_v56  ;;  %v746_v3 = vmul.f32 %v1620_v42, %v660_v57 }
  0xd1   : > { %1469 = vst [vmem:[%s1642_s19 + $0xc8] sm:$0xff] %v1413_v55   ;;  %v699_v62 = vmul.f32 %v1620_v42, %v542_v58  ;;  %v715_v63 = vmul.f32 %v1620_v42, %v582_v59 }
  0xd2   : > { %v798_v12 = vadd.f32 %v1626_v44, %v730_v2  ;;  %v814_v13 = vadd.f32 %v1626_v44, %v746_v3 }
  0xd3   : > { %v767_v0 = vadd.f32 %v1626_v44, %v699_v62  ;;  %v783_v1 = vadd.f32 %v1626_v44, %v715_v63 }
  0xd4   : > { %v862_v20 = vmax.f32 %v798_v12, 0.0  ;;  %v878_v21 = vmax.f32 %v814_v13, 0.0 }
  0xd5   : > { %v831_v6 = vmax.f32 %v767_v0, 0.0  ;;  %v847_v7 = vmax.f32 %v783_v1, 0.0 }
  0xd7   : > { %v1298_v8 = vpack.c.bf16 %v831_v6, %v830_v4  ;;  %v1338_v9 = vpack.c.bf16 %v847_v7, %v846_v5  ;;  %v622_v10 = vpop.f32.mrf.mxu2  ;;  %v662_v11 = vpop.f32.mrf.mxu3 }
  0xd8   : > { %v731_v14 = vmul.f32 %v1620_v42, %v622_v10  ;;  %v747_v15 = vmul.f32 %v1620_v42, %v662_v11  ;;  %v545_v16 = vpop.f32.mrf.mxu0  ;;  %v585_v17 = vpop.f32.mrf.mxu1 }
  0xd9   : > { %1446 = vst [vmem:[%s1642_s19 + $0x10] sm:$0xff] %v1298_v8   ;;  %v700_v24 = vmul.f32 %v1620_v42, %v545_v16  ;;  %v716_v25 = vmul.f32 %v1620_v42, %v585_v17 }
  0xda   : > { %1454 = vst [vmem:[%s1642_s19 + $0x50] sm:$0xff] %v1338_v9   ;;  %v799_v18 = vadd.f32 %v1626_v44, %v731_v14  ;;  %v815_v19 = vadd.f32 %v1626_v44, %v747_v15 }
  0xdb   : > { %v768_v32 = vadd.f32 %v1626_v44, %v700_v24  ;;  %v784_v33 = vadd.f32 %v1626_v44, %v716_v25 }
  0xdc   : > { %v863_v22 = vmax.f32 %v799_v18, 0.0  ;;  %v879_v23 = vmax.f32 %v815_v19, 0.0 }
  0xdd   : > { %v832_v40 = vmax.f32 %v768_v32, 0.0  ;;  %v848_v41 = vmax.f32 %v784_v33, 0.0 }
  0xde   : > { %v1378_v26 = vpack.c.bf16 %v863_v22, %v862_v20  ;;  %v1418_v27 = vpack.c.bf16 %v879_v23, %v878_v21 }
  0xdf   : > { %v625_v28 = vpop.f32.mrf.mxu2  ;;  %v665_v29 = vpop.f32.mrf.mxu3 }
  0xe0   : > { %1462 = vst [vmem:[%s1642_s19 + $0x90] sm:$0xff] %v1378_v26   ;;  %v547_v30 = vpop.f32.mrf.mxu0  ;;  %v587_v31 = vpop.f32.mrf.mxu1  ;;  %v732_v38 = vmul.f32 %v1620_v42, %v625_v28  ;;  %v748_v39 = vmul.f32 %v1620_v42, %v665_v29 }
  0xe1   : > { %1470 = vst [vmem:[%s1642_s19 + $0xd0] sm:$0xff] %v1418_v27   ;;  %v701_v34 = vmul.f32 %v1620_v42, %v547_v30  ;;  %v717_v35 = vmul.f32 %v1620_v42, %v587_v31 }
  0xe2   : > { %v800_v50 = vadd.f32 %v1626_v44, %v732_v38  ;;  %v816_v51 = vadd.f32 %v1626_v44, %v748_v39 }
  0xe3   : > { %v769_v36 = vadd.f32 %v1626_v44, %v701_v34  ;;  %v785_v37 = vadd.f32 %v1626_v44, %v717_v35 }
  0xe4   : > { %v864_v58 = vmax.f32 %v800_v50, 0.0  ;;  %v880_v59 = vmax.f32 %v816_v51, 0.0 }
  0xe5   : > { %v833_v43 = vmax.f32 %v769_v36, 0.0  ;;  %v849_v45 = vmax.f32 %v785_v37, 0.0 }
  0xe7   : > { %v1303_v46 = vpack.c.bf16 %v833_v43, %v832_v40  ;;  %v1343_v47 = vpack.c.bf16 %v849_v45, %v848_v41  ;;  %v627_v48 = vpop.f32.mrf.mxu2  ;;  %v667_v49 = vpop.f32.mrf.mxu3 }
  0xe8   : > { %v733_v52 = vmul.f32 %v1620_v42, %v627_v48  ;;  %v749_v53 = vmul.f32 %v1620_v42, %v667_v49  ;;  %v550_v54 = vpop.f32.mrf.mxu0  ;;  %v590_v55 = vpop.f32.mrf.mxu1 }
  0xe9   : > { %1447 = vst [vmem:[%s1642_s19 + $0x18] sm:$0xff] %v1303_v46   ;;  %v702_v62 = vmul.f32 %v1620_v42, %v550_v54  ;;  %v718_v63 = vmul.f32 %v1620_v42, %v590_v55 }
  0xea   : > { %1455 = vst [vmem:[%s1642_s19 + $0x58] sm:$0xff] %v1343_v47   ;;  %v801_v56 = vadd.f32 %v1626_v44, %v733_v52  ;;  %v817_v57 = vadd.f32 %v1626_v44, %v749_v53 }
  0xeb   : > { %v770_v6 = vadd.f32 %v1626_v44, %v702_v62  ;;  %v786_v7 = vadd.f32 %v1626_v44, %v718_v63 }
  0xec   : > { %v865_v60 = vmax.f32 %v801_v56, 0.0  ;;  %v881_v61 = vmax.f32 %v817_v57, 0.0 }
  0xed   : > { %v834_v14 = vmax.f32 %v770_v6, 0.0  ;;  %v850_v15 = vmax.f32 %v786_v7, 0.0 }
  0xee   : > { %v1383_v0 = vpack.c.bf16 %v865_v60, %v864_v58  ;;  %v1423_v1 = vpack.c.bf16 %v881_v61, %v880_v59 }
  0xef   : > { %v630_v2 = vpop.f32.mrf.mxu2  ;;  %v670_v3 = vpop.f32.mrf.mxu3 }
  0xf0   : > { %1463 = vst [vmem:[%s1642_s19 + $0x98] sm:$0xff] %v1383_v0   ;;  %v552_v4 = vpop.f32.mrf.mxu0  ;;  %v592_v5 = vpop.f32.mrf.mxu1  ;;  %v734_v12 = vmul.f32 %v1620_v42, %v630_v2  ;;  %v750_v13 = vmul.f32 %v1620_v42, %v670_v3 }
  0xf1   : > { %1471 = vst [vmem:[%s1642_s19 + $0xd8] sm:$0xff] %v1423_v1   ;;  %v703_v8 = vmul.f32 %v1620_v42, %v552_v4  ;;  %v719_v9 = vmul.f32 %v1620_v42, %v592_v5 }
  0xf2   : > { %v802_v22 = vadd.f32 %v1626_v44, %v734_v12  ;;  %v818_v23 = vadd.f32 %v1626_v44, %v750_v13 }
  0xf3   : > { %v771_v10 = vadd.f32 %v1626_v44, %v703_v8  ;;  %v787_v11 = vadd.f32 %v1626_v44, %v719_v9 }
  0xf4   : > { %v866_v30 = vmax.f32 %v802_v22, 0.0  ;;  %v882_v31 = vmax.f32 %v818_v23, 0.0 }
  0xf5   : > { %v835_v16 = vmax.f32 %v771_v10, 0.0  ;;  %v851_v17 = vmax.f32 %v787_v11, 0.0 }
  0xf7   : > { %v1308_v18 = vpack.c.bf16 %v835_v16, %v834_v14  ;;  %v1348_v19 = vpack.c.bf16 %v851_v17, %v850_v15  ;;  %v632_v20 = vpop.f32.mrf.mxu2  ;;  %v672_v21 = vpop.f32.mrf.mxu3 }
  0xf8   : > { %v735_v24 = vmul.f32 %v1620_v42, %v632_v20  ;;  %v751_v25 = vmul.f32 %v1620_v42, %v672_v21  ;;  %v555_v26 = vpop.f32.mrf.mxu0  ;;  %v595_v27 = vpop.f32.mrf.mxu1 }
  0xf9   : > { %1448 = vst [vmem:[%s1642_s19 + $0x20] sm:$0xff] %v1308_v18   ;;  %v704_v34 = vmul.f32 %v1620_v42, %v555_v26  ;;  %v720_v35 = vmul.f32 %v1620_v42, %v595_v27 }
  0xfa   : > { %1456 = vst [vmem:[%s1642_s19 + $0x60] sm:$0xff] %v1348_v19   ;;  %v803_v28 = vadd.f32 %v1626_v44, %v735_v24  ;;  %v819_v29 = vadd.f32 %v1626_v44, %v751_v25 }
  0xfb   : > { %v772_v43 = vadd.f32 %v1626_v44, %v704_v34  ;;  %v788_v45 = vadd.f32 %v1626_v44, %v720_v35 }
  0xfc   : > { %v867_v32 = vmax.f32 %v803_v28, 0.0  ;;  %v883_v33 = vmax.f32 %v819_v29, 0.0 }
  0xfd   : > { %v836_v52 = vmax.f32 %v772_v43, 0.0  ;;  %v852_v53 = vmax.f32 %v788_v45, 0.0 }
  0xfe   : > { %v1388_v36 = vpack.c.bf16 %v867_v32, %v866_v30  ;;  %v1428_v37 = vpack.c.bf16 %v883_v33, %v882_v31 }
  0xff   : > { %v635_v38 = vpop.f32.mrf.mxu2  ;;  %v675_v39 = vpop.f32.mrf.mxu3 }
 0x100   : > { %1464 = vst [vmem:[%s1642_s19 + $0xa0] sm:$0xff] %v1388_v36   ;;  %v557_v40 = vpop.f32.mrf.mxu0  ;;  %v597_v41 = vpop.f32.mrf.mxu1  ;;  %v736_v50 = vmul.f32 %v1620_v42, %v635_v38  ;;  %v752_v51 = vmul.f32 %v1620_v42, %v675_v39 }
 0x101   : > { %1472 = vst [vmem:[%s1642_s19 + $0xe0] sm:$0xff] %v1428_v37   ;;  %v705_v46 = vmul.f32 %v1620_v42, %v557_v40  ;;  %v721_v47 = vmul.f32 %v1620_v42, %v597_v41 }
 0x102   : > { %v804_v60 = vadd.f32 %v1626_v44, %v736_v50  ;;  %v820_v61 = vadd.f32 %v1626_v44, %v752_v51 }
 0x103   : > { %v773_v48 = vadd.f32 %v1626_v44, %v705_v46  ;;  %v789_v49 = vadd.f32 %v1626_v44, %v721_v47 }
 0x104   : > { %v868_v4 = vmax.f32 %v804_v60, 0.0  ;;  %v884_v5 = vmax.f32 %v820_v61, 0.0 }
 0x105   : > { %v837_v54 = vmax.f32 %v773_v48, 0.0  ;;  %v853_v55 = vmax.f32 %v789_v49, 0.0 }
 0x107   : > { %v1313_v56 = vpack.c.bf16 %v837_v54, %v836_v52  ;;  %v1353_v57 = vpack.c.bf16 %v853_v55, %v852_v53  ;;  %v637_v58 = vpop.f32.mrf.mxu2  ;;  %v677_v59 = vpop.f32.mrf.mxu3 }
 0x108   : > { %v737_v62 = vmul.f32 %v1620_v42, %v637_v58  ;;  %v753_v63 = vmul.f32 %v1620_v42, %v677_v59  ;;  %v560_v0 = vpop.f32.mrf.mxu0  ;;  %v600_v1 = vpop.f32.mrf.mxu1 }
 0x109   : > { %1449 = vst [vmem:[%s1642_s19 + $0x28] sm:$0xff] %v1313_v56   ;;  %v706_v8 = vmul.f32 %v1620_v42, %v560_v0  ;;  %v722_v9 = vmul.f32 %v1620_v42, %v600_v1 }
 0x10a   : > { %1457 = vst [vmem:[%s1642_s19 + $0x68] sm:$0xff] %v1353_v57   ;;  %v805_v2 = vadd.f32 %v1626_v44, %v737_v62  ;;  %v821_v3 = vadd.f32 %v1626_v44, %v753_v63 }
 0x10b   : > { %v774_v16 = vadd.f32 %v1626_v44, %v706_v8  ;;  %v790_v17 = vadd.f32 %v1626_v44, %v722_v9 }
 0x10c   : > { %v869_v6 = vmax.f32 %v805_v2, 0.0  ;;  %v885_v7 = vmax.f32 %v821_v3, 0.0 }
 0x10d   : > { %v838_v24 = vmax.f32 %v774_v16, 0.0  ;;  %v854_v25 = vmax.f32 %v790_v17, 0.0 }
 0x10e   : > { %v1393_v10 = vpack.c.bf16 %v869_v6, %v868_v4  ;;  %v1433_v11 = vpack.c.bf16 %v885_v7, %v884_v5 }
 0x10f   : > { %v640_v12 = vpop.f32.mrf.mxu2  ;;  %v680_v13 = vpop.f32.mrf.mxu3 }
 0x110   : > { %1465 = vst [vmem:[%s1642_s19 + $0xa8] sm:$0xff] %v1393_v10   ;;  %v562_v14 = vpop.f32.mrf.mxu0  ;;  %v602_v15 = vpop.f32.mrf.mxu1  ;;  %v738_v22 = vmul.f32 %v1620_v42, %v640_v12  ;;  %v754_v23 = vmul.f32 %v1620_v42, %v680_v13 }
 0x111   : > { %1473 = vst [vmem:[%s1642_s19 + $0xe8] sm:$0xff] %v1433_v11   ;;  %v707_v18 = vmul.f32 %v1620_v42, %v562_v14  ;;  %v723_v19 = vmul.f32 %v1620_v42, %v602_v15 }
 0x112   : > { %v806_v32 = vadd.f32 %v1626_v44, %v738_v22  ;;  %v822_v33 = vadd.f32 %v1626_v44, %v754_v23 }
 0x113   : > { %v775_v20 = vadd.f32 %v1626_v44, %v707_v18  ;;  %v791_v21 = vadd.f32 %v1626_v44, %v723_v19 }
 0x114   : > { %v870_v40 = vmax.f32 %v806_v32, 0.0  ;;  %v886_v41 = vmax.f32 %v822_v33, 0.0 }
 0x115   : > { %v839_v26 = vmax.f32 %v775_v20, 0.0  ;;  %v855_v27 = vmax.f32 %v791_v21, 0.0 }
 0x117   : > { %v1318_v28 = vpack.c.bf16 %v839_v26, %v838_v24  ;;  %v1358_v29 = vpack.c.bf16 %v855_v27, %v854_v25  ;;  %v642_v30 = vpop.f32.mrf.mxu2  ;;  %v682_v31 = vpop.f32.mrf.mxu3 }
 0x118   : > { %v739_v34 = vmul.f32 %v1620_v42, %v642_v30  ;;  %v755_v35 = vmul.f32 %v1620_v42, %v682_v31  ;;  %v565_v36 = vpop.f32.mrf.mxu0  ;;  %v605_v37 = vpop.f32.mrf.mxu1 }
 0x119   : > { %1450 = vst [vmem:[%s1642_s19 + $0x30] sm:$0xff] %v1318_v28   ;;  %v708_v46 = vmul.f32 %v1620_v42, %v565_v36  ;;  %v724_v47 = vmul.f32 %v1620_v42, %v605_v37 }
 0x11a   : > { %1458 = vst [vmem:[%s1642_s19 + $0x70] sm:$0xff] %v1358_v29   ;;  %v807_v38 = vadd.f32 %v1626_v44, %v739_v34  ;;  %v823_v39 = vadd.f32 %v1626_v44, %v755_v35 }
 0x11b   : > { %v776_v54 = vadd.f32 %v1626_v44, %v708_v46  ;;  %v792_v55 = vadd.f32 %v1626_v44, %v724_v47 }
 0x11c   : > { %v871_v43 = vmax.f32 %v807_v38, 0.0  ;;  %v887_v45 = vmax.f32 %v823_v39, 0.0 }
 0x11d   : > { %v840_v62 = vmax.f32 %v776_v54, 0.0  ;;  %v856_v63 = vmax.f32 %v792_v55, 0.0 }
 0x11e   : > { %v1398_v48 = vpack.c.bf16 %v871_v43, %v870_v40  ;;  %v1438_v49 = vpack.c.bf16 %v887_v45, %v886_v41 }
 0x11f   : > { %v645_v50 = vpop.f32.mrf.mxu2  ;;  %v685_v51 = vpop.f32.mrf.mxu3 }
 0x120   : > { %1466 = vst [vmem:[%s1642_s19 + $0xb0] sm:$0xff] %v1398_v48   ;;  %v567_v52 = vpop.f32.mrf.mxu0  ;;  %v607_v53 = vpop.f32.mrf.mxu1  ;;  %v740_v60 = vmul.f32 %v1620_v42, %v645_v50  ;;  %v756_v61 = vmul.f32 %v1620_v42, %v685_v51 }
 0x121   : > { %1474 = vst [vmem:[%s1642_s19 + $0xf0] sm:$0xff] %v1438_v49   ;;  %v709_v56 = vmul.f32 %v1620_v42, %v567_v52  ;;  %v725_v57 = vmul.f32 %v1620_v42, %v607_v53 }
 0x122   : > { %v808_v6 = vadd.f32 %v1626_v44, %v740_v60  ;;  %v824_v7 = vadd.f32 %v1626_v44, %v756_v61 }
 0x123   : > { %v777_v58 = vadd.f32 %v1626_v44, %v709_v56  ;;  %v793_v59 = vadd.f32 %v1626_v44, %v725_v57 }
 0x124   : > { %v872_v12 = vmax.f32 %v808_v6, 0.0  ;;  %v888_v13 = vmax.f32 %v824_v7, 0.0 }
 0x125   : > { %v841_v0 = vmax.f32 %v777_v58, 0.0  ;;  %v857_v1 = vmax.f32 %v793_v59, 0.0 }
 0x127   : > { %v1323_v2 = vpack.c.bf16 %v841_v0, %v840_v62  ;;  %v1363_v3 = vpack.c.bf16 %v857_v1, %v856_v63  ;;  %v647_v4 = vpop.f32.mrf.mxu2  ;;  %v687_v5 = vpop.f32.mrf.mxu3 }
 0x128   : > { %v741_v8 = vmul.f32 %v1620_v42, %v647_v4  ;;  %v757_v9 = vmul.f32 %v1620_v42, %v687_v5 }
 0x129   : > { %1451 = vst [vmem:[%s1642_s19 + $0x38] sm:$0xff] %v1323_v2  }
 0x12a   : > { %1459 = vst [vmem:[%s1642_s19 + $0x78] sm:$0xff] %v1363_v3   ;;  %v809_v10 = vadd.f32 %v1626_v44, %v741_v8  ;;  %v825_v11 = vadd.f32 %v1626_v44, %v757_v9 }
 0x12c   : > { %v873_v14 = vmax.f32 %v809_v10, 0.0  ;;  %v889_v15 = vmax.f32 %v825_v11, 0.0 }
 0x12e   : > { %v1403_v16 = vpack.c.bf16 %v873_v14, %v872_v12  ;;  %v1443_v17 = vpack.c.bf16 %v889_v15, %v888_v13 }
 0x130   : > { %1467 = vst [vmem:[%s1642_s19 + $0xb8] sm:$0xff] %v1403_v16  }
 0x131   : > { %1475 = vst [vmem:[%s1642_s19 + $0xf8] sm:$0xff] %v1443_v17  }
 0x132 PF: > { %s14_s15 = sadd.s32 1, %s1516_s15  }
 0x133   : > { %p11_p4 = scmp.ge.s32.totalorder %s14_s15, 4  }
 0x135   :  { %13 = sbr.rel (!%p11_p4) target bundleno = 1 (0x1), region = 66 }

// kernel: double_conv_fwd.3
= control target key start
LH: loop header
LB: loop body
LE: loop exit
PB: predicated region body
PF: predicated region fallthrough
CT: control target
= control target key end

     0   :  { %s1848_s15 = smov 0   ;;  %s2245_s0 = inlined_call_operand.vmem [shape: bf16[1024,256], index: 0, kind: input, shape index: {}]   ;;  %s2246_s1 = inlined_call_operand.vmem [shape: bf16[256,128], index: 1, kind: input, shape index: {}]   ;;  %s2247_s2 = inlined_call_operand.vmem [shape: f32[1,128], index: 2, kind: input, shape index: {}]   ;;  %s2248_s3 = inlined_call_operand.vmem [shape: f32[1,128], index: 3, kind: input, shape index: {}]   ;;  %s2249_s4 = inlined_call_operand.vmem [shape: f32[1024,128], index: 4, kind: output, shape index: {}]  }
   0x1 LB: > { %s1374_s16 = sadd.s32 4294967295, %s1821_s15   ;;  %p1378_p0 = scmp.ge.s32.totalorder %s1821_s15, 1  ;;  %s1821_s15 = sphi %s1848_s15, %s14_s15  }
   0x2   : > { %p164_p1 = scmp.lt.s32.totalorder %s1821_s15, 3 }
   0x4   : > { %p165_p2 = pnand %p1378_p0, %p164_p1 }
   0x5   : > { %s1379_s29 = sshll.u32 (!%p165_p2), %s1374_s16, 6 }
   0x6   : > { %168 = sbr.rel (%p165_p2) target bundleno = 433 (0x1b1), region = 36  ;;  %p192_p3 = scmp.lt.s32.totalorder (!%p165_p2), %s1379_s29, 127 }
   0xb   : > { %v1778_v0 = vld [vmem:[%s2246_s1 + $0x38] sm:$0xff]  ;;  %v1777_v2 = vld [vmem:[%s2246_s1 + $0x30] sm:$0xff]  ;;  %v1776_v4 = vld [vmem:[%s2246_s1 + $0x28] sm:$0xff]  ;;  %s2251_s29 = smov (!%p192_p3, %s1379_s29), 127 }
   0xc   : > { %v1786_v1 = vld [vmem:[%s2246_s1 + $0x78] sm:$0xff]  ;;  %716 = vmatpush.bf16.msra.mxu0 %v1778_v0  ;;  %1787 = vmatpush.bf16.msra.mxu2 %v1778_v0  ;;  %v1785_v3 = vld [vmem:[%s2246_s1 + $0x70] sm:$0xff]  ;;  %v1784_v5 = vld [vmem:[%s2246_s1 + $0x68] sm:$0xff]  ;;  %s1706_s17 = sshll.u32 %s2251_s29, 3 }
   0xd   : > { %885 = vmatpush.bf16.msra.mxu1 %v1786_v1  ;;  %1795 = vmatpush.bf16.msra.mxu3 %v1786_v1  ;;  %v1775_v6 = vld [vmem:[%s2246_s1 + $0x20] sm:$0xff]  ;;  %v1774_v8 = vld [vmem:[%s2246_s1 + $0x18] sm:$0xff]  ;;  %v1773_v10 = vld [vmem:[%s2246_s1 + $0x10] sm:$0xff]  ;;  %s1903_s22 = scalar_lea.vmem %s2245_s0, %s1706_s17  ;;  %s2003_s10 = scalar_lea.vmem %s2249_s4, %s1706_s17 }
   0xe   : > { %v1783_v7 = vld [vmem:[%s2246_s1 + $0x60] sm:$0xff]  ;;  %v1782_v9 = vld [vmem:[%s2246_s1 + $0x58] sm:$0xff]  ;;  %v1781_v11 = vld [vmem:[%s2246_s1 + $0x50] sm:$0xff] }
   0xf   : > { %v1772_v12 = vld [vmem:[%s2246_s1 + $0x8] sm:$0xff]  ;;  %v1771_v14 = vld [vmem:[%s2246_s1] sm:$0xff]  ;;  %v1394_v28 = vld [vmem:[%s1903_s22 + $0x10] sm:$0xf] }
  0x10   : > { %717 = vmatpush.bf16.msra.mxu0 %v1777_v2  ;;  %1788 = vmatpush.bf16.msra.mxu2 %v1777_v2  ;;  %v1780_v13 = vld [vmem:[%s2246_s1 + $0x48] sm:$0xff]  ;;  %v1779_v15 = vld [vmem:[%s2246_s1 + $0x40] sm:$0xff]  ;;  %v1710_v29 = vld [vmem:[%s1903_s22 + $0x14] sm:$0xf0] }
  0x11   : > { %886 = vmatpush.bf16.msra.mxu1 %v1785_v3  ;;  %1796 = vmatpush.bf16.msra.mxu3 %v1785_v3  ;;  %v1386_v16 = vld [vmem:[%s1903_s22] sm:$0xf]  ;;  %v1708_v17 = vld [vmem:[%s1903_s22 + $0x4] sm:$0xf0]  ;;  %v1707_v20 = vld [vmem:[%s1903_s22 + $0x4] sm:$0xf]  ;;  %v1395_v36 = vor.u32 %v1710_v29, %v1394_v28 }
  0x12   : > { %v1514_v18 = vld [vmem:[%s1903_s22 + $0x100] sm:$0xf]  ;;  %v1740_v19 = vld [vmem:[%s1903_s22 + $0x104] sm:$0xf0]  ;;  %v1388_v21 = vld [vmem:[%s1903_s22 + $0x8] sm:$0xf0]  ;;  %v1387_v24 = vor.u32 %v1708_v17, %v1386_v16 }
  0x13   : > { %v1739_v22 = vld [vmem:[%s1903_s22 + $0x104] sm:$0xf]  ;;  %v1516_v23 = vld [vmem:[%s1903_s22 + $0x108] sm:$0xf0]  ;;  %v1515_v25 = vor.u32 %v1740_v19, %v1514_v18  ;;  %v1391_v26 = vor.u32 %v1707_v20, %v1388_v21  ;;  %v1522_v30 = vld [vmem:[%s1903_s22 + $0x110] sm:$0xf] }
  0x14   : > { %718 = vmatpush.bf16.msra.mxu0 %v1776_v4  ;;  %1789 = vmatpush.bf16.msra.mxu2 %v1776_v4  ;;  %v1519_v27 = vor.u32 %v1739_v22, %v1516_v23  ;;  %v1742_v31 = vld [vmem:[%s1903_s22 + $0x114] sm:$0xf0]  ;;  %v1709_v32 = vld [vmem:[%s1903_s22 + $0x14] sm:$0xf]  ;;  %v1396_v33 = vld [vmem:[%s1903_s22 + $0x18] sm:$0xf0] }
  0x15   : > { %887 = vmatpush.bf16.msra.mxu1 %v1784_v5  ;;  %1797 = vmatpush.bf16.msra.mxu3 %v1784_v5  ;;  %v1741_v34 = vld [vmem:[%s1903_s22 + $0x114] sm:$0xf]  ;;  %v1524_v35 = vld [vmem:[%s1903_s22 + $0x118] sm:$0xf0]  ;;  %v1523_v37 = vor.u32 %v1742_v31, %v1522_v30  ;;  %v1399_v38 = vor.u32 %v1709_v32, %v1396_v33  ;;  %v1402_v40 = vld [vmem:[%s1903_s22 + $0x20] sm:$0xf] }
  0x16   : > { %v1527_v39 = vor.u32 %v1741_v34, %v1524_v35  ;;  %v1712_v41 = vld [vmem:[%s1903_s22 + $0x24] sm:$0xf0]  ;;  %v1530_v42 = vld [vmem:[%s1903_s22 + $0x120] sm:$0xf]  ;;  %v1711_v44 = vld [vmem:[%s1903_s22 + $0x24] sm:$0xf] }
  0x17   : > { %v1744_v43 = vld [vmem:[%s1903_s22 + $0x124] sm:$0xf0]  ;;  %v1404_v45 = vld [vmem:[%s1903_s22 + $0x28] sm:$0xf0]  ;;  %v1743_v46 = vld [vmem:[%s1903_s22 + $0x124] sm:$0xf]  ;;  %v1403_v48 = vor.u32 %v1712_v41, %v1402_v40 }
  0x18   : > { %719 = vmatpush.bf16.msra.mxu0 %v1775_v6  ;;  %1790 = vmatpush.bf16.msra.mxu2 %v1775_v6  ;;  %v1532_v47 = vld [vmem:[%s1903_s22 + $0x128] sm:$0xf0]  ;;  %v1531_v49 = vor.u32 %v1744_v43, %v1530_v42  ;;  %v1407_v50 = vor.u32 %v1711_v44, %v1404_v45  ;;  %v1410_v52 = vld [vmem:[%s1903_s22 + $0x30] sm:$0xf]  ;;  %v1714_v53 = vld [vmem:[%s1903_s22 + $0x34] sm:$0xf0] }
  0x19   : > { %888 = vmatpush.bf16.msra.mxu1 %v1783_v7  ;;  %1798 = vmatpush.bf16.msra.mxu3 %v1783_v7  ;;  %v1535_v51 = vor.u32 %v1743_v46, %v1532_v47  ;;  %v1538_v54 = vld [vmem:[%s1903_s22 + $0x130] sm:$0xf]  ;;  %v1746_v55 = vld [vmem:[%s1903_s22 + $0x134] sm:$0xf0]  ;;  %v1713_v56 = vld [vmem:[%s1903_s22 + $0x34] sm:$0xf]  ;;  %v1411_v60 = vor.u32 %v1714_v53, %v1410_v52 }
  0x1a   : > { %v1412_v57 = vld [vmem:[%s1903_s22 + $0x38] sm:$0xf0]  ;;  %v1745_v58 = vld [vmem:[%s1903_s22 + $0x134] sm:$0xf]  ;;  %v1539_v61 = vor.u32 %v1746_v55, %v1538_v54  ;;  %v1418_v0 = vld [vmem:[%s1903_s22 + $0x40] sm:$0xf] }
  0x1b   : > { %v1540_v59 = vld [vmem:[%s1903_s22 + $0x138] sm:$0xf0]  ;;  %v1415_v62 = vor.u32 %v1713_v56, %v1412_v57  ;;  %v1716_v1 = vld [vmem:[%s1903_s22 + $0x44] sm:$0xf0]  ;;  %v1546_v2 = vld [vmem:[%s1903_s22 + $0x140] sm:$0xf] }
  0x1c   : > { %720 = vmatpush.bf16.msra.mxu0 %v1774_v8  ;;  %1791 = vmatpush.bf16.msra.mxu2 %v1774_v8  ;;  %v1543_v63 = vor.u32 %v1745_v58, %v1540_v59  ;;  %v1748_v3 = vld [vmem:[%s1903_s22 + $0x144] sm:$0xf0]  ;;  %v1715_v4 = vld [vmem:[%s1903_s22 + $0x44] sm:$0xf]  ;;  %v1420_v5 = vld [vmem:[%s1903_s22 + $0x48] sm:$0xf0]  ;;  %v1419_v8 = vor.u32 %v1716_v1, %v1418_v0 }
  0x1d   : > { %889 = vmatpush.bf16.msra.mxu1 %v1782_v9  ;;  %1799 = vmatpush.bf16.msra.mxu3 %v1782_v9  ;;  %v1747_v6 = vld [vmem:[%s1903_s22 + $0x144] sm:$0xf]  ;;  %v1548_v7 = vld [vmem:[%s1903_s22 + $0x148] sm:$0xf0]  ;;  %v1547_v9 = vor.u32 %v1748_v3, %v1546_v2  ;;  %v1717_v16 = vld [vmem:[%s1903_s22 + $0x54] sm:$0xf] }
  0x1e   : > { %v1428_v17 = vld [vmem:[%s1903_s22 + $0x58] sm:$0xf0]  ;;  %v1749_v18 = vld [vmem:[%s1903_s22 + $0x154] sm:$0xf]  ;;  %v1719_v28 = vld [vmem:[%s1903_s22 + $0x64] sm:$0xf] }
  0x1f   : > { %v1556_v19 = vld [vmem:[%s1903_s22 + $0x158] sm:$0xf0]  ;;  %v1431_v22 = vor.u32 %v1717_v16, %v1428_v17  ;;  %v1436_v29 = vld [vmem:[%s1903_s22 + $0x68] sm:$0xf0]  ;;  %v1751_v30 = vld [vmem:[%s1903_s22 + $0x164] sm:$0xf] }
  0x20   : > { %721 = vmatpush.bf16.msra.mxu0 %v1773_v10  ;;  %1792 = vmatpush.bf16.msra.mxu2 %v1773_v10  ;;  %v1423_v10 = vor.u32 %v1715_v4, %v1420_v5  ;;  %v1559_v23 = vor.u32 %v1749_v18, %v1556_v19  ;;  %v1564_v31 = vld [vmem:[%s1903_s22 + $0x168] sm:$0xf0]  ;;  %v1439_v34 = vor.u32 %v1719_v28, %v1436_v29  ;;  %v1721_v40 = vld [vmem:[%s1903_s22 + $0x74] sm:$0xf]  ;;  %v1444_v41 = vld [vmem:[%s1903_s22 + $0x78] sm:$0xf0] }
  0x21   : > { %890 = vmatpush.bf16.msra.mxu1 %v1781_v11  ;;  %1800 = vmatpush.bf16.msra.mxu3 %v1781_v11  ;;  %v1551_v11 = vor.u32 %v1747_v6, %v1548_v7  ;;  %v1567_v35 = vor.u32 %v1751_v30, %v1564_v31  ;;  %v1753_v42 = vld [vmem:[%s1903_s22 + $0x174] sm:$0xf]  ;;  %v1572_v43 = vld [vmem:[%s1903_s22 + $0x178] sm:$0xf0]  ;;  %v1447_v46 = vor.u32 %v1721_v40, %v1444_v41  ;;  %v1723_v52 = vld [vmem:[%s1903_s22 + $0x84] sm:$0xf] }
  0x22   : > { %v1575_v47 = vor.u32 %v1753_v42, %v1572_v43  ;;  %v1452_v53 = vld [vmem:[%s1903_s22 + $0x88] sm:$0xf0]  ;;  %v1755_v54 = vld [vmem:[%s1903_s22 + $0x184] sm:$0xf]  ;;  %v1989_v59 = vld [vmem:[%s2247_s2] ss:$0 sm:$0xff] }
  0x23   : > { %v1580_v55 = vld [vmem:[%s1903_s22 + $0x188] sm:$0xf0]  ;;  %v1994_v0 = vld [vmem:[%s2248_s3] ss:$0 sm:$0xff]  ;;  %v1758_v16 = vld [vmem:[%s1903_s22 + $0x194] sm:$0xf0] }
  0x24   : > { %722 = vmatpush.bf16.msra.mxu0 %v1772_v12  ;;  %1793 = vmatpush.bf16.msra.mxu2 %v1772_v12  ;;  %v1426_v12 = vld [vmem:[%s1903_s22 + $0x50] sm:$0xf]  ;;  %v1725_v17 = vld [vmem:[%s1903_s22 + $0x94] sm:$0xf]  ;;  %v1460_v18 = vld [vmem:[%s1903_s22 + $0x98] sm:$0xf0] }
  0x25   : > { %891 = vmatpush.bf16.msra.mxu1 %v1780_v13  ;;  %1801 = vmatpush.bf16.msra.mxu3 %v1780_v13  ;;  %v1718_v13 = vld [vmem:[%s1903_s22 + $0x54] sm:$0xf0]  ;;  %v1757_v19 = vld [vmem:[%s1903_s22 + $0x194] sm:$0xf]  ;;  %v1463_v30 = vor.u32 %v1725_v17, %v1460_v18 }
  0x26   : > { %v1427_v20 = vor.u32 %v1718_v13, %v1426_v12  ;;  %v1726_v12 = vld [vmem:[%s1903_s22 + $0x94] sm:$0xf0] }
  0x28   : > { %723 = vmatpush.bf16.msra.mxu0 %v1771_v14  ;;  %1794 = vmatpush.bf16.msra.mxu2 %v1771_v14  ;;  %v1554_v14 = vld [vmem:[%s1903_s22 + $0x150] sm:$0xf] }
  0x29   : > { %892 = vmatpush.bf16.msra.mxu1 %v1779_v15  ;;  %1802 = vmatpush.bf16.msra.mxu3 %v1779_v15  ;;  %v1750_v15 = vld [vmem:[%s1903_s22 + $0x154] sm:$0xf0] }
  0x2a   : > { %v1555_v21 = vor.u32 %v1750_v15, %v1554_v14  ;;  %v1586_v15 = vld [vmem:[%s1903_s22 + $0x190] sm:$0xf] }
  0x2b   : > { %724 = vmatmul.bf16.vlgmr.msra.gmra.mxu0 %v1387_v24  ;;  %804 = vmatmul.bf16.vlgmr.msra.gmra.mxu2 %v1515_v25  ;;  %v1434_v24 = vld [vmem:[%s1903_s22 + $0x60] sm:$0xf]  ;;  %v1720_v25 = vld [vmem:[%s1903_s22 + $0x64] sm:$0xf0] }
  0x2c   : > { %893 = vmatmul.bf16.vlgmr.msra.gmra.mxu1 %v1391_v26  ;;  %973 = vmatmul.bf16.vlgmr.msra.gmra.mxu3 %v1519_v27  ;;  %v1562_v26 = vld [vmem:[%s1903_s22 + $0x160] sm:$0xf]  ;;  %v1752_v27 = vld [vmem:[%s1903_s22 + $0x164] sm:$0xf0]  ;;  %v1435_v32 = vor.u32 %v1720_v25, %v1434_v24 }
  0x2d   : > { %v1563_v33 = vor.u32 %v1752_v27, %v1562_v26  ;;  %v1587_v26 = vor.u32 %v1758_v16, %v1586_v15 }
  0x3b   : > { %729 = vmatmul.bf16.gmra.mxu0 %v1395_v36  ;;  %809 = vmatmul.bf16.gmra.mxu2 %v1523_v37  ;;  %v1442_v36 = vld [vmem:[%s1903_s22 + $0x70] sm:$0xf]  ;;  %v1722_v37 = vld [vmem:[%s1903_s22 + $0x74] sm:$0xf0] }
  0x3c   : > { %898 = vmatmul.bf16.gmra.mxu1 %v1399_v38  ;;  %978 = vmatmul.bf16.gmra.mxu3 %v1527_v39  ;;  %v1570_v38 = vld [vmem:[%s1903_s22 + $0x170] sm:$0xf]  ;;  %v1754_v39 = vld [vmem:[%s1903_s22 + $0x174] sm:$0xf0]  ;;  %v1443_v44 = vor.u32 %v1722_v37, %v1442_v36 }
  0x3d   : > { %v1571_v45 = vor.u32 %v1754_v39, %v1570_v38 }
  0x4b   : > { %734 = vmatmul.bf16.gmra.mxu0 %v1403_v48  ;;  %814 = vmatmul.bf16.gmra.mxu2 %v1531_v49  ;;  %v1450_v48 = vld [vmem:[%s1903_s22 + $0x80] sm:$0xf]  ;;  %v1724_v49 = vld [vmem:[%s1903_s22 + $0x84] sm:$0xf0] }
  0x4c   : > { %903 = vmatmul.bf16.gmra.mxu1 %v1407_v50  ;;  %983 = vmatmul.bf16.gmra.mxu3 %v1535_v51  ;;  %v1578_v50 = vld [vmem:[%s1903_s22 + $0x180] sm:$0xf]  ;;  %v1756_v51 = vld [vmem:[%s1903_s22 + $0x184] sm:$0xf0]  ;;  %v1451_v56 = vor.u32 %v1724_v49, %v1450_v48 }
  0x4d   : > { %v1579_v57 = vor.u32 %v1756_v51, %v1578_v50  ;;  %v1728_v48 = vld [vmem:[%s1903_s22 + $0xa4] sm:$0xf0]  ;;  %v1594_v51 = vld [vmem:[%s1903_s22 + $0x1a0] sm:$0xf] }
  0x5b   : > { %739 = vmatmul.bf16.gmra.mxu0 %v1411_v60  ;;  %819 = vmatmul.bf16.gmra.mxu2 %v1539_v61  ;;  %v1455_v60 = vor.u32 %v1723_v52, %v1452_v53  ;;  %v1583_v61 = vor.u32 %v1755_v54, %v1580_v55  ;;  %v1760_v52 = vld [vmem:[%s1903_s22 + $0x1a4] sm:$0xf0]  ;;  %v1727_v53 = vld [vmem:[%s1903_s22 + $0xa4] sm:$0xf]  ;;  %v1468_v54 = vld [vmem:[%s1903_s22 + $0xa8] sm:$0xf0] }
  0x5c   : > { %908 = vmatmul.bf16.gmra.mxu1 %v1415_v62  ;;  %988 = vmatmul.bf16.gmra.mxu3 %v1543_v63  ;;  %v1759_v55 = vld [vmem:[%s1903_s22 + $0x1a4] sm:$0xf] }
  0x6b   : > { %744 = vmatmul.bf16.gmra.mxu0 %v1419_v8  ;;  %824 = vmatmul.bf16.gmra.mxu2 %v1547_v9 }
  0x6c   : > { %913 = vmatmul.bf16.gmra.mxu1 %v1423_v10  ;;  %993 = vmatmul.bf16.gmra.mxu3 %v1551_v11  ;;  %v1458_v11 = vld [vmem:[%s1903_s22 + $0x90] sm:$0xf] }
  0x6d   : > { %v1459_v25 = vor.u32 %v1726_v12, %v1458_v11 }
  0x7b   : > { %749 = vmatmul.bf16.gmra.mxu0 %v1427_v20  ;;  %829 = vmatmul.bf16.gmra.mxu2 %v1555_v21  ;;  %v1588_v20 = vld [vmem:[%s1903_s22 + $0x198] sm:$0xf0] }
  0x7c   : > { %918 = vmatmul.bf16.gmra.mxu1 %v1431_v22  ;;  %998 = vmatmul.bf16.gmra.mxu3 %v1559_v23  ;;  %v1591_v31 = vor.u32 %v1757_v19, %v1588_v20 }
  0x8b   : > { %754 = vmatmul.bf16.gmra.mxu0 %v1435_v32  ;;  %834 = vmatmul.bf16.gmra.mxu2 %v1563_v33 }
  0x8c   : > { %923 = vmatmul.bf16.gmra.mxu1 %v1439_v34  ;;  %1003 = vmatmul.bf16.gmra.mxu3 %v1567_v35 }
  0x9b   : > { %759 = vmatmul.bf16.gmra.mxu0 %v1443_v44  ;;  %839 = vmatmul.bf16.gmra.mxu2 %v1571_v45 }
  0x9c   : > { %928 = vmatmul.bf16.gmra.mxu1 %v1447_v46  ;;  %1008 = vmatmul.bf16.gmra.mxu3 %v1575_v47  ;;  %v1466_v47 = vld [vmem:[%s1903_s22 + $0xa0] sm:$0xf] }
  0xa8   : > { %v725_v58 = vpop.f32.mrf.mxu0 }
  0xa9   : > { %v894_v62 = vpop.f32.mrf.mxu1 }
  0xaa   : > { %v895_v63 = vadd.f32 %v894_v62, %v725_v58  ;;  %v1467_v62 = vor.u32 %v1728_v48, %v1466_v47 }
  0xab   : > { %764 = vmatmul.bf16.gmra.mxu0 %v1451_v56  ;;  %844 = vmatmul.bf16.gmra.mxu2 %v1579_v57  ;;  %v1596_v56 = vld [vmem:[%s1903_s22 + $0x1a8] sm:$0xf0] }
  0xac   : > { %v1058_v1 = vmul.f32 %v1989_v59, %v895_v63  ;;  %933 = vmatmul.bf16.gmra.mxu1 %v1455_v60  ;;  %1013 = vmatmul.bf16.gmra.mxu3 %v1583_v61  ;;  %v1595_v63 = vor.u32 %v1760_v52, %v1594_v51 }
  0xae   : > { %v1126_v2 = vadd.f32 %v1994_v0, %v1058_v1  ;;  %v805_v3 = vpop.f32.mrf.mxu2 }
  0xaf   : > { %v974_v4 = vpop.f32.mrf.mxu3 }
  0xb0   : > { %v1190_v5 = vmax.f32 %v1126_v2, 0.0  ;;  %v975_v6 = vadd.f32 %v974_v4, %v805_v3  ;;  %v727_v7 = vpop.f32.mrf.mxu0  ;;  %v1471_v4 = vor.u32 %v1727_v53, %v1468_v54 }
  0xb1   : > { %v896_v8 = vpop.f32.mrf.mxu1 }
  0xb2   : > { %1254 = vst [vmem:[%s2003_s10] sm:$0xff] %v1190_v5  ;;  %v1090_v9 = vmul.f32 %v1989_v59, %v975_v6  ;;  %v897_v10 = vadd.f32 %v896_v8, %v727_v7  ;;  %v1599_v5 = vor.u32 %v1759_v55, %v1596_v56 }
  0xb4   : > { %v1158_v13 = vadd.f32 %v1994_v0, %v1090_v9  ;;  %v1059_v14 = vmul.f32 %v1989_v59, %v897_v10 }
  0xb6   : > { %v1222_v21 = vmax.f32 %v1158_v13, 0.0  ;;  %v1127_v22 = vadd.f32 %v1994_v0, %v1059_v14  ;;  %v807_v23 = vpop.f32.mrf.mxu2 }
  0xb7   : > { %v976_v24 = vpop.f32.mrf.mxu3 }
  0xb8   : > { %1286 = vst [vmem:[%s2003_s10 + $0x100] sm:$0xff] %v1222_v21  ;;  %v1191_v27 = vmax.f32 %v1127_v22, 0.0  ;;  %v977_v28 = vadd.f32 %v976_v24, %v807_v23  ;;  %v730_v29 = vpop.f32.mrf.mxu0  ;;  %v1474_v21 = vld [vmem:[%s1903_s22 + $0xb0] sm:$0xf]  ;;  %v1730_v22 = vld [vmem:[%s1903_s22 + $0xb4] sm:$0xf0] }
  0xb9   : > { %v899_v32 = vpop.f32.mrf.mxu1 }
  0xba   : > { %1255 = vst [vmem:[%s2003_s10 + $0x8] sm:$0xff] %v1191_v27  ;;  %v1091_v33 = vmul.f32 %v1989_v59, %v977_v28  ;;  %v900_v34 = vadd.f32 %v899_v32, %v730_v29  ;;  %v1729_v27 = vld [vmem:[%s1903_s22 + $0xb4] sm:$0xf]  ;;  %v1476_v28 = vld [vmem:[%s1903_s22 + $0xb8] sm:$0xf0] }
  0xbb   : > { %769 = vmatmul.bf16.gmra.mxu0 %v1459_v25  ;;  %849 = vmatmul.bf16.gmra.mxu2 %v1587_v26  ;;  %v1602_v25 = vld [vmem:[%s1903_s22 + $0x1b0] sm:$0xf]  ;;  %v1762_v26 = vld [vmem:[%s1903_s22 + $0x1b4] sm:$0xf0]  ;;  %v1761_v29 = vld [vmem:[%s1903_s22 + $0x1b4] sm:$0xf] }
  0xbc   : > { %v1159_v35 = vadd.f32 %v1994_v0, %v1091_v33  ;;  %v1060_v36 = vmul.f32 %v1989_v59, %v900_v34  ;;  %938 = vmatmul.bf16.gmra.mxu1 %v1463_v30  ;;  %1018 = vmatmul.bf16.gmra.mxu3 %v1591_v31  ;;  %v1604_v30 = vld [vmem:[%s1903_s22 + $0x1b8] sm:$0xf0] }
  0xbe   : > { %v1223_v37 = vmax.f32 %v1159_v35, 0.0  ;;  %v1128_v38 = vadd.f32 %v1994_v0, %v1060_v36  ;;  %v810_v39 = vpop.f32.mrf.mxu2  ;;  %v1475_v35 = vor.u32 %v1730_v22, %v1474_v21  ;;  %v1603_v36 = vor.u32 %v1762_v26, %v1602_v25 }
  0xbf   : > { %v979_v40 = vpop.f32.mrf.mxu3 }
  0xc0   : > { %1287 = vst [vmem:[%s2003_s10 + $0x108] sm:$0xff] %v1223_v37  ;;  %v1192_v41 = vmax.f32 %v1128_v38, 0.0  ;;  %v980_v42 = vadd.f32 %v979_v40, %v810_v39  ;;  %v732_v43 = vpop.f32.mrf.mxu0  ;;  %v1479_v40 = vor.u32 %v1729_v27, %v1476_v28 }
  0xc1   : > { %v901_v44 = vpop.f32.mrf.mxu1 }
  0xc2   : > { %1256 = vst [vmem:[%s2003_s10 + $0x10] sm:$0xff] %v1192_v41  ;;  %v1092_v45 = vmul.f32 %v1989_v59, %v980_v42  ;;  %v902_v46 = vadd.f32 %v901_v44, %v732_v43  ;;  %v1607_v41 = vor.u32 %v1761_v29, %v1604_v30 }
  0xc4   : > { %v1160_v49 = vadd.f32 %v1994_v0, %v1092_v45  ;;  %v1061_v50 = vmul.f32 %v1989_v59, %v902_v46 }
  0xc6   : > { %v1224_v57 = vmax.f32 %v1160_v49, 0.0  ;;  %v1129_v58 = vadd.f32 %v1994_v0, %v1061_v50  ;;  %v812_v60 = vpop.f32.mrf.mxu2 }
  0xc7   : > { %v981_v61 = vpop.f32.mrf.mxu3 }
  0xc8   : > { %1288 = vst [vmem:[%s2003_s10 + $0x110] sm:$0xff] %v1224_v57  ;;  %v1193_v1 = vmax.f32 %v1129_v58, 0.0  ;;  %v982_v2 = vadd.f32 %v981_v61, %v812_v60  ;;  %v735_v3 = vpop.f32.mrf.mxu0  ;;  %v1482_v57 = vld [vmem:[%s1903_s22 + $0xc0] sm:$0xf]  ;;  %v1732_v58 = vld [vmem:[%s1903_s22 + $0xc4] sm:$0xf0] }
  0xc9   : > { %v904_v6 = vpop.f32.mrf.mxu1 }
  0xca   : > { %1257 = vst [vmem:[%s2003_s10 + $0x18] sm:$0xff] %v1193_v1  ;;  %v1093_v7 = vmul.f32 %v1989_v59, %v982_v2  ;;  %v905_v8 = vadd.f32 %v904_v6, %v735_v3  ;;  %v1731_v1 = vld [vmem:[%s1903_s22 + $0xc4] sm:$0xf]  ;;  %v1484_v2 = vld [vmem:[%s1903_s22 + $0xc8] sm:$0xf0] }
  0xcb   : > { %774 = vmatmul.bf16.gmra.mxu0 %v1467_v62  ;;  %854 = vmatmul.bf16.gmra.mxu2 %v1595_v63  ;;  %v1610_v62 = vld [vmem:[%s1903_s22 + $0x1c0] sm:$0xf]  ;;  %v1764_v63 = vld [vmem:[%s1903_s22 + $0x1c4] sm:$0xf0]  ;;  %v1763_v3 = vld [vmem:[%s1903_s22 + $0x1c4] sm:$0xf] }
  0xcc   : > { %v1161_v9 = vadd.f32 %v1994_v0, %v1093_v7  ;;  %v1062_v10 = vmul.f32 %v1989_v59, %v905_v8  ;;  %943 = vmatmul.bf16.gmra.mxu1 %v1471_v4  ;;  %1023 = vmatmul.bf16.gmra.mxu3 %v1599_v5  ;;  %v1612_v4 = vld [vmem:[%s1903_s22 + $0x1c8] sm:$0xf0] }
  0xce   : > { %v1225_v11 = vmax.f32 %v1161_v9, 0.0  ;;  %v1130_v12 = vadd.f32 %v1994_v0, %v1062_v10  ;;  %v815_v13 = vpop.f32.mrf.mxu2  ;;  %v1483_v9 = vor.u32 %v1732_v58, %v1482_v57  ;;  %v1611_v10 = vor.u32 %v1764_v63, %v1610_v62 }
  0xcf   : > { %v984_v14 = vpop.f32.mrf.mxu3 }
  0xd0   : > { %1289 = vst [vmem:[%s2003_s10 + $0x118] sm:$0xff] %v1225_v11  ;;  %v1194_v15 = vmax.f32 %v1130_v12, 0.0  ;;  %v985_v16 = vadd.f32 %v984_v14, %v815_v13  ;;  %v737_v17 = vpop.f32.mrf.mxu0  ;;  %v1487_v14 = vor.u32 %v1731_v1, %v1484_v2 }
  0xd1   : > { %v906_v18 = vpop.f32.mrf.mxu1 }
  0xd2   : > { %1258 = vst [vmem:[%s2003_s10 + $0x20] sm:$0xff] %v1194_v15  ;;  %v1094_v19 = vmul.f32 %v1989_v59, %v985_v16  ;;  %v907_v20 = vadd.f32 %v906_v18, %v737_v17  ;;  %v1615_v15 = vor.u32 %v1763_v3, %v1612_v4 }
  0xd4   : > { %v1162_v23 = vadd.f32 %v1994_v0, %v1094_v19  ;;  %v1063_v24 = vmul.f32 %v1989_v59, %v907_v20 }
  0xd6   : > { %v1226_v31 = vmax.f32 %v1162_v23, 0.0  ;;  %v1131_v32 = vadd.f32 %v1994_v0, %v1063_v24  ;;  %v817_v33 = vpop.f32.mrf.mxu2 }
  0xd7   : > { %v986_v34 = vpop.f32.mrf.mxu3 }
  0xd8   : > { %1290 = vst [vmem:[%s2003_s10 + $0x120] sm:$0xff] %v1226_v31  ;;  %v1195_v37 = vmax.f32 %v1131_v32, 0.0  ;;  %v987_v38 = vadd.f32 %v986_v34, %v817_v33  ;;  %v740_v39 = vpop.f32.mrf.mxu0  ;;  %v1490_v31 = vld [vmem:[%s1903_s22 + $0xd0] sm:$0xf]  ;;  %v1734_v32 = vld [vmem:[%s1903_s22 + $0xd4] sm:$0xf0] }
  0xd9   : > { %v909_v42 = vpop.f32.mrf.mxu1 }
  0xda   : > { %1259 = vst [vmem:[%s2003_s10 + $0x28] sm:$0xff] %v1195_v37  ;;  %v1095_v43 = vmul.f32 %v1989_v59, %v987_v38  ;;  %v910_v44 = vadd.f32 %v909_v42, %v740_v39  ;;  %v1733_v37 = vld [vmem:[%s1903_s22 + $0xd4] sm:$0xf]  ;;  %v1492_v38 = vld [vmem:[%s1903_s22 + $0xd8] sm:$0xf0] }
  0xdb   : > { %779 = vmatmul.bf16.gmra.mxu0 %v1475_v35  ;;  %859 = vmatmul.bf16.gmra.mxu2 %v1603_v36  ;;  %v1618_v35 = vld [vmem:[%s1903_s22 + $0x1d0] sm:$0xf]  ;;  %v1766_v36 = vld [vmem:[%s1903_s22 + $0x1d4] sm:$0xf0]  ;;  %v1765_v39 = vld [vmem:[%s1903_s22 + $0x1d4] sm:$0xf] }
  0xdc   : > { %v1163_v45 = vadd.f32 %v1994_v0, %v1095_v43  ;;  %v1064_v46 = vmul.f32 %v1989_v59, %v910_v44  ;;  %948 = vmatmul.bf16.gmra.mxu1 %v1479_v40  ;;  %1028 = vmatmul.bf16.gmra.mxu3 %v1607_v41  ;;  %v1620_v40 = vld [vmem:[%s1903_s22 + $0x1d8] sm:$0xf0] }
  0xde   : > { %v1227_v47 = vmax.f32 %v1163_v45, 0.0  ;;  %v1132_v48 = vadd.f32 %v1994_v0, %v1064_v46  ;;  %v820_v49 = vpop.f32.mrf.mxu2  ;;  %v1491_v45 = vor.u32 %v1734_v32, %v1490_v31  ;;  %v1619_v46 = vor.u32 %v1766_v36, %v1618_v35 }
  0xdf   : > { %v989_v50 = vpop.f32.mrf.mxu3 }
  0xe0   : > { %1291 = vst [vmem:[%s2003_s10 + $0x128] sm:$0xff] %v1227_v47  ;;  %v1196_v51 = vmax.f32 %v1132_v48, 0.0  ;;  %v990_v52 = vadd.f32 %v989_v50, %v820_v49  ;;  %v742_v53 = vpop.f32.mrf.mxu0  ;;  %v1495_v50 = vor.u32 %v1733_v37, %v1492_v38 }
  0xe1   : > { %v911_v54 = vpop.f32.mrf.mxu1 }
  0xe2   : > { %1260 = vst [vmem:[%s2003_s10 + $0x30] sm:$0xff] %v1196_v51  ;;  %v1096_v55 = vmul.f32 %v1989_v59, %v990_v52  ;;  %v912_v56 = vadd.f32 %v911_v54, %v742_v53  ;;  %v1623_v51 = vor.u32 %v1765_v39, %v1620_v40 }
  0xe4   : > { %v1164_v60 = vadd.f32 %v1994_v0, %v1096_v55  ;;  %v1065_v61 = vmul.f32 %v1989_v59, %v912_v56 }
  0xe6   : > { %v1228_v5 = vmax.f32 %v1164_v60, 0.0  ;;  %v1133_v6 = vadd.f32 %v1994_v0, %v1065_v61  ;;  %v822_v7 = vpop.f32.mrf.mxu2 }
  0xe7   : > { %v991_v8 = vpop.f32.mrf.mxu3 }
  0xe8   : > { %1292 = vst [vmem:[%s2003_s10 + $0x130] sm:$0xff] %v1228_v5  ;;  %v1197_v11 = vmax.f32 %v1133_v6, 0.0  ;;  %v992_v12 = vadd.f32 %v991_v8, %v822_v7  ;;  %v745_v13 = vpop.f32.mrf.mxu0  ;;  %v1498_v5 = vld [vmem:[%s1903_s22 + $0xe0] sm:$0xf]  ;;  %v1736_v6 = vld [vmem:[%s1903_s22 + $0xe4] sm:$0xf0] }
  0xe9   : > { %v914_v16 = vpop.f32.mrf.mxu1 }
  0xea   : > { %1261 = vst [vmem:[%s2003_s10 + $0x38] sm:$0xff] %v1197_v11  ;;  %v1097_v17 = vmul.f32 %v1989_v59, %v992_v12  ;;  %v915_v18 = vadd.f32 %v914_v16, %v745_v13  ;;  %v1735_v11 = vld [vmem:[%s1903_s22 + $0xe4] sm:$0xf]  ;;  %v1500_v12 = vld [vmem:[%s1903_s22 + $0xe8] sm:$0xf0] }
  0xeb   : > { %784 = vmatmul.bf16.gmra.mxu0 %v1483_v9  ;;  %864 = vmatmul.bf16.gmra.mxu2 %v1611_v10  ;;  %v1626_v9 = vld [vmem:[%s1903_s22 + $0x1e0] sm:$0xf]  ;;  %v1768_v10 = vld [vmem:[%s1903_s22 + $0x1e4] sm:$0xf0]  ;;  %v1767_v13 = vld [vmem:[%s1903_s22 + $0x1e4] sm:$0xf] }
  0xec   : > { %v1165_v19 = vadd.f32 %v1994_v0, %v1097_v17  ;;  %v1066_v20 = vmul.f32 %v1989_v59, %v915_v18  ;;  %953 = vmatmul.bf16.gmra.mxu1 %v1487_v14  ;;  %1033 = vmatmul.bf16.gmra.mxu3 %v1615_v15  ;;  %v1628_v14 = vld [vmem:[%s1903_s22 + $0x1e8] sm:$0xf0] }
  0xee   : > { %v1229_v21 = vmax.f32 %v1165_v19, 0.0  ;;  %v1134_v22 = vadd.f32 %v1994_v0, %v1066_v20  ;;  %v825_v23 = vpop.f32.mrf.mxu2  ;;  %v1499_v19 = vor.u32 %v1736_v6, %v1498_v5  ;;  %v1627_v20 = vor.u32 %v1768_v10, %v1626_v9 }
  0xef   : > { %v994_v24 = vpop.f32.mrf.mxu3 }
  0xf0   : > { %1293 = vst [vmem:[%s2003_s10 + $0x138] sm:$0xff] %v1229_v21  ;;  %v1198_v25 = vmax.f32 %v1134_v22, 0.0  ;;  %v995_v26 = vadd.f32 %v994_v24, %v825_v23  ;;  %v747_v27 = vpop.f32.mrf.mxu0  ;;  %v1503_v24 = vor.u32 %v1735_v11, %v1500_v12 }
  0xf1   : > { %v916_v28 = vpop.f32.mrf.mxu1 }
  0xf2   : > { %1262 = vst [vmem:[%s2003_s10 + $0x40] sm:$0xff] %v1198_v25  ;;  %v1098_v29 = vmul.f32 %v1989_v59, %v995_v26  ;;  %v917_v30 = vadd.f32 %v916_v28, %v747_v27  ;;  %v1631_v25 = vor.u32 %v1767_v13, %v1628_v14 }
  0xf4   : > { %v1166_v33 = vadd.f32 %v1994_v0, %v1098_v29  ;;  %v1067_v34 = vmul.f32 %v1989_v59, %v917_v30 }
  0xf6   : > { %v1230_v41 = vmax.f32 %v1166_v33, 0.0  ;;  %v1135_v42 = vadd.f32 %v1994_v0, %v1067_v34  ;;  %v827_v43 = vpop.f32.mrf.mxu2 }
  0xf7   : > { %v996_v44 = vpop.f32.mrf.mxu3 }
  0xf8   : > { %1294 = vst [vmem:[%s2003_s10 + $0x140] sm:$0xff] %v1230_v41  ;;  %v1199_v47 = vmax.f32 %v1135_v42, 0.0  ;;  %v997_v48 = vadd.f32 %v996_v44, %v827_v43  ;;  %v750_v49 = vpop.f32.mrf.mxu0  ;;  %v1506_v41 = vld [vmem:[%s1903_s22 + $0xf0] sm:$0xf]  ;;  %v1738_v42 = vld [vmem:[%s1903_s22 + $0xf4] sm:$0xf0] }
  0xf9   : > { %v919_v52 = vpop.f32.mrf.mxu1 }
  0xfa   : > { %1263 = vst [vmem:[%s2003_s10 + $0x48] sm:$0xff] %v1199_v47  ;;  %v1099_v53 = vmul.f32 %v1989_v59, %v997_v48  ;;  %v920_v54 = vadd.f32 %v919_v52, %v750_v49  ;;  %v1737_v47 = vld [vmem:[%s1903_s22 + $0xf4] sm:$0xf]  ;;  %v1508_v48 = vld [vmem:[%s1903_s22 + $0xf8] sm:$0xf0] }
  0xfb   : > { %789 = vmatmul.bf16.gmra.mxu0 %v1491_v45  ;;  %869 = vmatmul.bf16.gmra.mxu2 %v1619_v46  ;;  %v1634_v45 = vld [vmem:[%s1903_s22 + $0x1f0] sm:$0xf]  ;;  %v1770_v46 = vld [vmem:[%s1903_s22 + $0x1f4] sm:$0xf0]  ;;  %v1769_v49 = vld [vmem:[%s1903_s22 + $0x1f4] sm:$0xf] }
  0xfc   : > { %v1167_v55 = vadd.f32 %v1994_v0, %v1099_v53  ;;  %v1068_v56 = vmul.f32 %v1989_v59, %v920_v54  ;;  %958 = vmatmul.bf16.gmra.mxu1 %v1495_v50  ;;  %1038 = vmatmul.bf16.gmra.mxu3 %v1623_v51  ;;  %v1636_v50 = vld [vmem:[%s1903_s22 + $0x1f8] sm:$0xf0] }
  0xfe   : > { %v1231_v57 = vmax.f32 %v1167_v55, 0.0  ;;  %v1136_v58 = vadd.f32 %v1994_v0, %v1068_v56  ;;  %v830_v60 = vpop.f32.mrf.mxu2  ;;  %v1507_v55 = vor.u32 %v1738_v42, %v1506_v41  ;;  %v1635_v56 = vor.u32 %v1770_v46, %v1634_v45 }
  0xff   : > { %v999_v61 = vpop.f32.mrf.mxu3 }
 0x100   : > { %1295 = vst [vmem:[%s2003_s10 + $0x148] sm:$0xff] %v1231_v57  ;;  %v1200_v62 = vmax.f32 %v1136_v58, 0.0  ;;  %v1000_v63 = vadd.f32 %v999_v61, %v830_v60  ;;  %v752_v1 = vpop.f32.mrf.mxu0  ;;  %v1511_v61 = vor.u32 %v1737_v47, %v1508_v48 }
 0x101   : > { %v921_v2 = vpop.f32.mrf.mxu1 }
 0x102   : > { %1264 = vst [vmem:[%s2003_s10 + $0x50] sm:$0xff] %v1200_v62  ;;  %v1100_v3 = vmul.f32 %v1989_v59, %v1000_v63  ;;  %v922_v4 = vadd.f32 %v921_v2, %v752_v1  ;;  %v1639_v62 = vor.u32 %v1769_v49, %v1636_v50 }
 0x104   : > { %v1168_v7 = vadd.f32 %v1994_v0, %v1100_v3  ;;  %v1069_v8 = vmul.f32 %v1989_v59, %v922_v4 }
 0x106   : > { %v1232_v15 = vmax.f32 %v1168_v7, 0.0  ;;  %v1137_v16 = vadd.f32 %v1994_v0, %v1069_v8  ;;  %v832_v17 = vpop.f32.mrf.mxu2 }
 0x107   : > { %v1001_v18 = vpop.f32.mrf.mxu3 }
 0x108   : > { %1296 = vst [vmem:[%s2003_s10 + $0x150] sm:$0xff] %v1232_v15  ;;  %v1201_v21 = vmax.f32 %v1137_v16, 0.0  ;;  %v1002_v22 = vadd.f32 %v1001_v18, %v832_v17  ;;  %v755_v23 = vpop.f32.mrf.mxu0 }
 0x109   : > { %v924_v26 = vpop.f32.mrf.mxu1 }
 0x10a   : > { %1265 = vst [vmem:[%s2003_s10 + $0x58] sm:$0xff] %v1201_v21  ;;  %v1101_v27 = vmul.f32 %v1989_v59, %v1002_v22  ;;  %v925_v28 = vadd.f32 %v924_v26, %v755_v23 }
 0x10b   : > { %794 = vmatmul.bf16.gmra.mxu0 %v1499_v19  ;;  %874 = vmatmul.bf16.gmra.mxu2 %v1627_v20 }
 0x10c   : > { %v1169_v29 = vadd.f32 %v1994_v0, %v1101_v27  ;;  %v1070_v30 = vmul.f32 %v1989_v59, %v925_v28  ;;  %963 = vmatmul.bf16.gmra.mxu1 %v1503_v24  ;;  %1043 = vmatmul.bf16.gmra.mxu3 %v1631_v25 }
 0x10e   : > { %v1233_v31 = vmax.f32 %v1169_v29, 0.0  ;;  %v1138_v32 = vadd.f32 %v1994_v0, %v1070_v30  ;;  %v835_v33 = vpop.f32.mrf.mxu2 }
 0x10f   : > { %v1004_v34 = vpop.f32.mrf.mxu3 }
 0x110   : > { %1297 = vst [vmem:[%s2003_s10 + $0x158] sm:$0xff] %v1233_v31  ;;  %v1202_v35 = vmax.f32 %v1138_v32, 0.0  ;;  %v1005_v36 = vadd.f32 %v1004_v34, %v835_v33  ;;  %v757_v37 = vpop.f32.mrf.mxu0 }
 0x111   : > { %v926_v38 = vpop.f32.mrf.mxu1 }
 0x112   : > { %1266 = vst [vmem:[%s2003_s10 + $0x60] sm:$0xff] %v1202_v35  ;;  %v1102_v39 = vmul.f32 %v1989_v59, %v1005_v36  ;;  %v927_v40 = vadd.f32 %v926_v38, %v757_v37 }
 0x114   : > { %v1170_v43 = vadd.f32 %v1994_v0, %v1102_v39  ;;  %v1071_v44 = vmul.f32 %v1989_v59, %v927_v40 }
 0x116   : > { %v1234_v51 = vmax.f32 %v1170_v43, 0.0  ;;  %v1139_v52 = vadd.f32 %v1994_v0, %v1071_v44  ;;  %v837_v53 = vpop.f32.mrf.mxu2 }
 0x117   : > { %v1006_v54 = vpop.f32.mrf.mxu3 }
 0x118   : > { %1298 = vst [vmem:[%s2003_s10 + $0x160] sm:$0xff] %v1234_v51  ;;  %v1203_v57 = vmax.f32 %v1139_v52, 0.0  ;;  %v1007_v58 = vadd.f32 %v1006_v54, %v837_v53  ;;  %v760_v60 = vpop.f32.mrf.mxu0 }
 0x119   : > { %v929_v63 = vpop.f32.mrf.mxu1 }
 0x11a   : > { %1267 = vst [vmem:[%s2003_s10 + $0x68] sm:$0xff] %v1203_v57  ;;  %v1103_v1 = vmul.f32 %v1989_v59, %v1007_v58  ;;  %v930_v2 = vadd.f32 %v929_v63, %v760_v60 }
 0x11b   : > { %799 = vmatmul.bf16.gmra.mxu0 %v1507_v55  ;;  %879 = vmatmul.bf16.gmra.mxu2 %v1635_v56 }
 0x11c   : > { %v1171_v3 = vadd.f32 %v1994_v0, %v1103_v1  ;;  %v1072_v4 = vmul.f32 %v1989_v59, %v930_v2  ;;  %968 = vmatmul.bf16.gmra.mxu1 %v1511_v61  ;;  %1048 = vmatmul.bf16.gmra.mxu3 %v1639_v62 }
 0x11e   : > { %v1235_v5 = vmax.f32 %v1171_v3, 0.0  ;;  %v1140_v6 = vadd.f32 %v1994_v0, %v1072_v4  ;;  %v840_v7 = vpop.f32.mrf.mxu2 }
 0x11f   : > { %v1009_v8 = vpop.f32.mrf.mxu3 }
 0x120   : > { %1299 = vst [vmem:[%s2003_s10 + $0x168] sm:$0xff] %v1235_v5  ;;  %v1204_v9 = vmax.f32 %v1140_v6, 0.0  ;;  %v1010_v10 = vadd.f32 %v1009_v8, %v840_v7  ;;  %v762_v11 = vpop.f32.mrf.mxu0 }
 0x121   : > { %v931_v12 = vpop.f32.mrf.mxu1 }
 0x122   : > { %1268 = vst [vmem:[%s2003_s10 + $0x70] sm:$0xff] %v1204_v9  ;;  %v1104_v13 = vmul.f32 %v1989_v59, %v1010_v10  ;;  %v932_v14 = vadd.f32 %v931_v12, %v762_v11 }
 0x124   : > { %v1172_v15 = vadd.f32 %v1994_v0, %v1104_v13  ;;  %v1073_v16 = vmul.f32 %v1989_v59, %v932_v14 }
 0x126   : > { %v1236_v17 = vmax.f32 %v1172_v15, 0.0  ;;  %v1141_v18 = vadd.f32 %v1994_v0, %v1073_v16  ;;  %v842_v19 = vpop.f32.mrf.mxu2 }
 0x127   : > { %v1011_v20 = vpop.f32.mrf.mxu3 }
 0x128   : > { %1300 = vst [vmem:[%s2003_s10 + $0x170] sm:$0xff] %v1236_v17  ;;  %v1205_v21 = vmax.f32 %v1141_v18, 0.0  ;;  %v1012_v22 = vadd.f32 %v1011_v20, %v842_v19  ;;  %v765_v23 = vpop.f32.mrf.mxu0 }
 0x129   : > { %v934_v24 = vpop.f32.mrf.mxu1 }
 0x12a   : > { %1269 = vst [vmem:[%s2003_s10 + $0x78] sm:$0xff] %v1205_v21  ;;  %v1105_v25 = vmul.f32 %v1989_v59, %v1012_v22  ;;  %v935_v26 = vadd.f32 %v934_v24, %v765_v23 }
 0x12c   : > { %v1173_v27 = vadd.f32 %v1994_v0, %v1105_v25  ;;  %v1074_v28 = vmul.f32 %v1989_v59, %v935_v26 }
 0x12e   : > { %v1237_v29 = vmax.f32 %v1173_v27, 0.0  ;;  %v1142_v30 = vadd.f32 %v1994_v0, %v1074_v28  ;;  %v845_v31 = vpop.f32.mrf.mxu2 }
 0x12f   : > { %v1014_v32 = vpop.f32.mrf.mxu3 }
 0x130   : > { %1301 = vst [vmem:[%s2003_s10 + $0x178] sm:$0xff] %v1237_v29  ;;  %v1206_v33 = vmax.f32 %v1142_v30, 0.0  ;;  %v1015_v34 = vadd.f32 %v1014_v32, %v845_v31  ;;  %v767_v35 = vpop.f32.mrf.mxu0 }
 0x131   : > { %v936_v36 = vpop.f32.mrf.mxu1 }
 0x132   : > { %1270 = vst [vmem:[%s2003_s10 + $0x80] sm:$0xff] %v1206_v33  ;;  %v1106_v37 = vmul.f32 %v1989_v59, %v1015_v34  ;;  %v937_v38 = vadd.f32 %v936_v36, %v767_v35 }
 0x134   : > { %v1174_v39 = vadd.f32 %v1994_v0, %v1106_v37  ;;  %v1075_v40 = vmul.f32 %v1989_v59, %v937_v38 }
 0x136   : > { %v1238_v41 = vmax.f32 %v1174_v39, 0.0  ;;  %v1143_v42 = vadd.f32 %v1994_v0, %v1075_v40  ;;  %v847_v43 = vpop.f32.mrf.mxu2 }
 0x137   : > { %v1016_v44 = vpop.f32.mrf.mxu3 }
 0x138   : > { %1302 = vst [vmem:[%s2003_s10 + $0x180] sm:$0xff] %v1238_v41  ;;  %v1207_v45 = vmax.f32 %v1143_v42, 0.0  ;;  %v1017_v46 = vadd.f32 %v1016_v44, %v847_v43  ;;  %v770_v47 = vpop.f32.mrf.mxu0 }
 0x139   : > { %v939_v48 = vpop.f32.mrf.mxu1 }
 0x13a   : > { %1271 = vst [vmem:[%s2003_s10 + $0x88] sm:$0xff] %v1207_v45  ;;  %v1107_v49 = vmul.f32 %v1989_v59, %v1017_v46  ;;  %v940_v50 = vadd.f32 %v939_v48, %v770_v47 }
 0x13c   : > { %v1175_v51 = vadd.f32 %v1994_v0, %v1107_v49  ;;  %v1076_v52 = vmul.f32 %v1989_v59, %v940_v50 }
 0x13e   : > { %v1239_v53 = vmax.f32 %v1175_v51, 0.0  ;;  %v1144_v54 = vadd.f32 %v1994_v0, %v1076_v52  ;;  %v850_v55 = vpop.f32.mrf.mxu2 }
 0x13f   : > { %v1019_v56 = vpop.f32.mrf.mxu3 }
 0x140   : > { %1303 = vst [vmem:[%s2003_s10 + $0x188] sm:$0xff] %v1239_v53  ;;  %v1208_v57 = vmax.f32 %v1144_v54, 0.0  ;;  %v1020_v58 = vadd.f32 %v1019_v56, %v850_v55  ;;  %v772_v60 = vpop.f32.mrf.mxu0 }
 0x141   : > { %v941_v61 = vpop.f32.mrf.mxu1 }
 0x142   : > { %1272 = vst [vmem:[%s2003_s10 + $0x90] sm:$0xff] %v1208_v57  ;;  %v1108_v62 = vmul.f32 %v1989_v59, %v1020_v58  ;;  %v942_v63 = vadd.f32 %v941_v61, %v772_v60 }
 0x144   : > { %v1176_v1 = vadd.f32 %v1994_v0, %v1108_v62  ;;  %v1077_v2 = vmul.f32 %v1989_v59, %v942_v63 }
 0x146   : > { %v1240_v3 = vmax.f32 %v1176_v1, 0.0  ;;  %v1145_v4 = vadd.f32 %v1994_v0, %v1077_v2  ;;  %v852_v5 = vpop.f32.mrf.mxu2 }
 0x147   : > { %v1021_v6 = vpop.f32.mrf.mxu3 }
 0x148   : > { %1304 = vst [vmem:[%s2003_s10 + $0x190] sm:$0xff] %v1240_v3  ;;  %v1209_v7 = vmax.f32 %v1145_v4, 0.0  ;;  %v1022_v8 = vadd.f32 %v1021_v6, %v852_v5  ;;  %v775_v9 = vpop.f32.mrf.mxu0 }
 0x149   : > { %v944_v10 = vpop.f32.mrf.mxu1 }
 0x14a   : > { %1273 = vst [vmem:[%s2003_s10 + $0x98] sm:$0xff] %v1209_v7  ;;  %v1109_v11 = vmul.f32 %v1989_v59, %v1022_v8  ;;  %v945_v12 = vadd.f32 %v944_v10, %v775_v9 }
 0x14c   : > { %v1177_v13 = vadd.f32 %v1994_v0, %v1109_v11  ;;  %v1078_v14 = vmul.f32 %v1989_v59, %v945_v12 }
 0x14e   : > { %v1241_v15 = vmax.f32 %v1177_v13, 0.0  ;;  %v1146_v16 = vadd.f32 %v1994_v0, %v1078_v14  ;;  %v855_v17 = vpop.f32.mrf.mxu2 }
 0x14f   : > { %v1024_v18 = vpop.f32.mrf.mxu3 }
 0x150   : > { %1305 = vst [vmem:[%s2003_s10 + $0x198] sm:$0xff] %v1241_v15  ;;  %v1210_v19 = vmax.f32 %v1146_v16, 0.0  ;;  %v1025_v20 = vadd.f32 %v1024_v18, %v855_v17  ;;  %v777_v21 = vpop.f32.mrf.mxu0 }
 0x151   : > { %v946_v22 = vpop.f32.mrf.mxu1 }
 0x152   : > { %1274 = vst [vmem:[%s2003_s10 + $0xa0] sm:$0xff] %v1210_v19  ;;  %v1110_v23 = vmul.f32 %v1989_v59, %v1025_v20  ;;  %v947_v24 = vadd.f32 %v946_v22, %v777_v21 }
 0x154   : > { %v1178_v25 = vadd.f32 %v1994_v0, %v1110_v23  ;;  %v1079_v26 = vmul.f32 %v1989_v59, %v947_v24 }
 0x156   : > { %v1242_v27 = vmax.f32 %v1178_v25, 0.0  ;;  %v1147_v28 = vadd.f32 %v1994_v0, %v1079_v26  ;;  %v857_v29 = vpop.f32.mrf.mxu2 }
 0x157   : > { %v1026_v30 = vpop.f32.mrf.mxu3 }
 0x158   : > { %1306 = vst [vmem:[%s2003_s10 + $0x1a0] sm:$0xff] %v1242_v27  ;;  %v1211_v31 = vmax.f32 %v1147_v28, 0.0  ;;  %v1027_v32 = vadd.f32 %v1026_v30, %v857_v29  ;;  %v780_v33 = vpop.f32.mrf.mxu0 }
 0x159   : > { %v949_v34 = vpop.f32.mrf.mxu1 }
 0x15a   : > { %1275 = vst [vmem:[%s2003_s10 + $0xa8] sm:$0xff] %v1211_v31  ;;  %v1111_v35 = vmul.f32 %v1989_v59, %v1027_v32  ;;  %v950_v36 = vadd.f32 %v949_v34, %v780_v33 }
 0x15c   : > { %v1179_v37 = vadd.f32 %v1994_v0, %v1111_v35  ;;  %v1080_v38 = vmul.f32 %v1989_v59, %v950_v36 }
 0x15e   : > { %v1243_v39 = vmax.f32 %v1179_v37, 0.0  ;;  %v1148_v40 = vadd.f32 %v1994_v0, %v1080_v38  ;;  %v860_v41 = vpop.f32.mrf.mxu2 }
 0x15f   : > { %v1029_v42 = vpop.f32.mrf.mxu3 }
 0x160   : > { %1307 = vst [vmem:[%s2003_s10 + $0x1a8] sm:$0xff] %v1243_v39  ;;  %v1212_v43 = vmax.f32 %v1148_v40, 0.0  ;;  %v1030_v44 = vadd.f32 %v1029_v42, %v860_v41  ;;  %v782_v45 = vpop.f32.mrf.mxu0 }
 0x161   : > { %v951_v46 = vpop.f32.mrf.mxu1 }
 0x162   : > { %1276 = vst [vmem:[%s2003_s10 + $0xb0] sm:$0xff] %v1212_v43  ;;  %v1112_v47 = vmul.f32 %v1989_v59, %v1030_v44  ;;  %v952_v48 = vadd.f32 %v951_v46, %v782_v45 }
 0x164   : > { %v1180_v49 = vadd.f32 %v1994_v0, %v1112_v47  ;;  %v1081_v50 = vmul.f32 %v1989_v59, %v952_v48  ;;  %v1813_v48 = vld [vmem:[%s2247_s2] ss:$0 sm:$0xff] }
 0x166   : > { %v1244_v51 = vmax.f32 %v1180_v49, 0.0  ;;  %v1149_v52 = vadd.f32 %v1994_v0, %v1081_v50  ;;  %v862_v53 = vpop.f32.mrf.mxu2 }
 0x167   : > { %v1031_v54 = vpop.f32.mrf.mxu3 }
 0x168   : > { %1308 = vst [vmem:[%s2003_s10 + $0x1b0] sm:$0xff] %v1244_v51  ;;  %v1213_v55 = vmax.f32 %v1149_v52, 0.0  ;;  %v1032_v56 = vadd.f32 %v1031_v54, %v862_v53  ;;  %v785_v57 = vpop.f32.mrf.mxu0 }
 0x169   : > { %v954_v58 = vpop.f32.mrf.mxu1 }
 0x16a   : > { %1277 = vst [vmem:[%s2003_s10 + $0xb8] sm:$0xff] %v1213_v55  ;;  %v1113_v60 = vmul.f32 %v1989_v59, %v1032_v56  ;;  %v955_v61 = vadd.f32 %v954_v58, %v785_v57 }
 0x16c   : > { %v1181_v62 = vadd.f32 %v1994_v0, %v1113_v60  ;;  %v1082_v63 = vmul.f32 %v1989_v59, %v955_v61  ;;  %v1814_v60 = vld [vmem:[%s2248_s3] ss:$0 sm:$0xff] }
 0x16e   : > { %v1245_v1 = vmax.f32 %v1181_v62, 0.0  ;;  %v1150_v2 = vadd.f32 %v1994_v0, %v1082_v63  ;;  %v865_v3 = vpop.f32.mrf.mxu2 }
 0x16f   : > { %v1034_v4 = vpop.f32.mrf.mxu3 }
 0x170   : > { %1309 = vst [vmem:[%s2003_s10 + $0x1b8] sm:$0xff] %v1245_v1  ;;  %v1214_v5 = vmax.f32 %v1150_v2, 0.0  ;;  %v1035_v6 = vadd.f32 %v1034_v4, %v865_v3  ;;  %v787_v7 = vpop.f32.mrf.mxu0 }
 0x171   : > { %v956_v8 = vpop.f32.mrf.mxu1 }
 0x172   : > { %1278 = vst [vmem:[%s2003_s10 + $0xc0] sm:$0xff] %v1214_v5  ;;  %v1114_v9 = vmul.f32 %v1989_v59, %v1035_v6  ;;  %v957_v10 = vadd.f32 %v956_v8, %v787_v7 }
 0x174   : > { %v1182_v11 = vadd.f32 %v1994_v0, %v1114_v9  ;;  %v1083_v12 = vmul.f32 %v1989_v59, %v957_v10 }
 0x176   : > { %v1246_v13 = vmax.f32 %v1182_v11, 0.0  ;;  %v1151_v14 = vadd.f32 %v1994_v0, %v1083_v12  ;;  %v867_v15 = vpop.f32.mrf.mxu2 }
 0x177   : > { %v1036_v16 = vpop.f32.mrf.mxu3 }
 0x178   : > { %1310 = vst [vmem:[%s2003_s10 + $0x1c0] sm:$0xff] %v1246_v13  ;;  %v1215_v17 = vmax.f32 %v1151_v14, 0.0  ;;  %v1037_v18 = vadd.f32 %v1036_v16, %v867_v15  ;;  %v790_v19 = vpop.f32.mrf.mxu0 }
 0x179   : > { %v959_v20 = vpop.f32.mrf.mxu1 }
 0x17a   : > { %1279 = vst [vmem:[%s2003_s10 + $0xc8] sm:$0xff] %v1215_v17  ;;  %v1115_v21 = vmul.f32 %v1989_v59, %v1037_v18  ;;  %v960_v22 = vadd.f32 %v959_v20, %v790_v19 }
 0x17c   : > { %v1183_v23 = vadd.f32 %v1994_v0, %v1115_v21  ;;  %v1084_v24 = vmul.f32 %v1989_v59, %v960_v22 }
 0x17e   : > { %v1247_v25 = vmax.f32 %v1183_v23, 0.0  ;;  %v1152_v26 = vadd.f32 %v1994_v0, %v1084_v24  ;;  %v870_v27 = vpop.f32.mrf.mxu2 }
 0x17f   : > { %v1039_v28 = vpop.f32.mrf.mxu3 }
 0x180   : > { %1311 = vst [vmem:[%s2003_s10 + $0x1c8] sm:$0xff] %v1247_v25  ;;  %v1216_v29 = vmax.f32 %v1152_v26, 0.0  ;;  %v1040_v30 = vadd.f32 %v1039_v28, %v870_v27  ;;  %v792_v31 = vpop.f32.mrf.mxu0 }
 0x181   : > { %v961_v32 = vpop.f32.mrf.mxu1 }
 0x182   : > { %1280 = vst [vmem:[%s2003_s10 + $0xd0] sm:$0xff] %v1216_v29  ;;  %v1116_v33 = vmul.f32 %v1989_v59, %v1040_v30  ;;  %v962_v34 = vadd.f32 %v961_v32, %v792_v31 }
 0x184   : > { %v1184_v35 = vadd.f32 %v1994_v0, %v1116_v33  ;;  %v1085_v36 = vmul.f32 %v1989_v59, %v962_v34 }
 0x186   : > { %v1248_v37 = vmax.f32 %v1184_v35, 0.0  ;;  %v1153_v38 = vadd.f32 %v1994_v0, %v1085_v36  ;;  %v872_v39 = vpop.f32.mrf.mxu2 }
 0x187   : > { %v1041_v40 = vpop.f32.mrf.mxu3 }
 0x188   : > { %1312 = vst [vmem:[%s2003_s10 + $0x1d0] sm:$0xff] %v1248_v37  ;;  %v1217_v41 = vmax.f32 %v1153_v38, 0.0  ;;  %v1042_v42 = vadd.f32 %v1041_v40, %v872_v39  ;;  %v795_v43 = vpop.f32.mrf.mxu0 }
 0x189   : > { %v964_v44 = vpop.f32.mrf.mxu1 }
 0x18a   : > { %1281 = vst [vmem:[%s2003_s10 + $0xd8] sm:$0xff] %v1217_v41  ;;  %v1117_v45 = vmul.f32 %v1989_v59, %v1042_v42  ;;  %v965_v46 = vadd.f32 %v964_v44, %v795_v43 }
 0x18c   : > { %v1185_v47 = vadd.f32 %v1994_v0, %v1117_v45  ;;  %v1086_v49 = vmul.f32 %v1813_v48, %v965_v46 }
 0x18e   : > { %v1249_v50 = vmax.f32 %v1185_v47, 0.0  ;;  %v1154_v51 = vadd.f32 %v1994_v0, %v1086_v49  ;;  %v875_v52 = vpop.f32.mrf.mxu2 }
 0x18f   : > { %v1044_v53 = vpop.f32.mrf.mxu3 }
 0x190   : > { %1313 = vst [vmem:[%s2003_s10 + $0x1d8] sm:$0xff] %v1249_v50  ;;  %v1218_v54 = vmax.f32 %v1154_v51, 0.0  ;;  %v1045_v55 = vadd.f32 %v1044_v53, %v875_v52  ;;  %v797_v56 = vpop.f32.mrf.mxu0 }
 0x191   : > { %v966_v57 = vpop.f32.mrf.mxu1 }
 0x192   : > { %1282 = vst [vmem:[%s2003_s10 + $0xe0] sm:$0xff] %v1218_v54  ;;  %v1118_v59 = vmul.f32 %v1813_v48, %v1045_v55  ;;  %v967_v58 = vadd.f32 %v966_v57, %v797_v56 }
 0x194   : > { %v1186_v61 = vadd.f32 %v1814_v60, %v1118_v59  ;;  %v1087_v62 = vmul.f32 %v1813_v48, %v967_v58 }
 0x196   : > { %v1250_v63 = vmax.f32 %v1186_v61, 0.0  ;;  %v1155_v0 = vadd.f32 %v1814_v60, %v1087_v62  ;;  %v877_v1 = vpop.f32.mrf.mxu2 }
 0x197   : > { %v1046_v2 = vpop.f32.mrf.mxu3 }
 0x198   : > { %1314 = vst [vmem:[%s2003_s10 + $0x1e0] sm:$0xff] %v1250_v63  ;;  %v1219_v3 = vmax.f32 %v1155_v0, 0.0  ;;  %v1047_v4 = vadd.f32 %v1046_v2, %v877_v1  ;;  %v800_v5 = vpop.f32.mrf.mxu0 }
 0x199   : > { %v969_v6 = vpop.f32.mrf.mxu1 }
 0x19a   : > { %1283 = vst [vmem:[%s2003_s10 + $0xe8] sm:$0xff] %v1219_v3  ;;  %v1119_v7 = vmul.f32 %v1813_v48, %v1047_v4  ;;  %v970_v8 = vadd.f32 %v969_v6, %v800_v5 }
 0x19c   : > { %v1187_v9 = vadd.f32 %v1814_v60, %v1119_v7  ;;  %v1088_v10 = vmul.f32 %v1813_v48, %v970_v8 }
 0x19e   : > { %v1251_v11 = vmax.f32 %v1187_v9, 0.0  ;;  %v1156_v12 = vadd.f32 %v1814_v60, %v1088_v10  ;;  %v880_v13 = vpop.f32.mrf.mxu2 }
 0x19f   : > { %v1049_v14 = vpop.f32.mrf.mxu3 }
 0x1a0   : > { %1315 = vst [vmem:[%s2003_s10 + $0x1e8] sm:$0xff] %v1251_v11  ;;  %v1220_v15 = vmax.f32 %v1156_v12, 0.0  ;;  %v1050_v16 = vadd.f32 %v1049_v14, %v880_v13  ;;  %v802_v17 = vpop.f32.mrf.mxu0 }
 0x1a1   : > { %v971_v18 = vpop.f32.mrf.mxu1 }
 0x1a2   : > { %1284 = vst [vmem:[%s2003_s10 + $0xf0] sm:$0xff] %v1220_v15  ;;  %v1120_v19 = vmul.f32 %v1813_v48, %v1050_v16  ;;  %v972_v20 = vadd.f32 %v971_v18, %v802_v17 }
 0x1a4   : > { %v1188_v21 = vadd.f32 %v1814_v60, %v1120_v19  ;;  %v1089_v22 = vmul.f32 %v1813_v48, %v972_v20 }
 0x1a6   : > { %v1252_v23 = vmax.f32 %v1188_v21, 0.0  ;;  %v1157_v24 = vadd.f32 %v1814_v60, %v1089_v22  ;;  %v882_v25 = vpop.f32.mrf.mxu2 }
 0x1a7   : > { %v1051_v26 = vpop.f32.mrf.mxu3 }
 0x1a8   : > { %1316 = vst [vmem:[%s2003_s10 + $0x1f0] sm:$0xff] %v1252_v23  ;;  %v1221_v27 = vmax.f32 %v1157_v24, 0.0  ;;  %v1052_v28 = vadd.f32 %v1051_v26, %v882_v25 }
 0x1aa   : > { %1285 = vst [vmem:[%s2003_s10 + $0xf8] sm:$0xff] %v1221_v27  ;;  %v1121_v29 = vmul.f32 %v1813_v48, %v1052_v28 }
 0x1ac   : > { %v1189_v30 = vadd.f32 %v1814_v60, %v1121_v29 }
 0x1ae   : > { %v1253_v31 = vmax.f32 %v1189_v30, 0.0 }
 0x1b0   : > { %1317 = vst [vmem:[%s2003_s10 + $0x1f8] sm:$0xff] %v1253_v31 }
 0x1b1 PF: > { %s14_s15 = sadd.s32 1, %s1821_s15  }
 0x1b2   : > { %p11_p4 = scmp.ge.s32.totalorder %s14_s15, 4  }
 0x1b4   :  { %13 = sbr.rel (!%p11_p4) target bundleno = 1 (0x1), region = 66 }

</bundles_post_ra>
